<compile_context>
chip_gen: v7x
topology: tpu7x:2x2x1
jax: 0.10.0
libtpu: 0.0.40
codegen_flags: <defaults>
</compile_context>

<pallas_src>
import functools

import jax
import jax.numpy as jnp
from jax import lax
from jax.experimental import pallas as pl
from jax.experimental.pallas import tpu as pltpu


def lstm_ecg_kernel(T, E, H,
                    x_ref, len_ref, w_ref, b01_ref,
                    wc_ref, bc_ref, wf_ref, bf_ref,
                    out_ref):
    """x_ref: (T, Bb, E) bf16 time-major input block.  out_ref: (Bb, Np) f32."""
    Bb = len_ref.shape[0]
    f32 = jnp.float32
    bf16 = jnp.bfloat16

    # Unpack the packed LSTM weight slab (static, sublane-aligned row slices, bf16).
    wih0 = w_ref[0:E, :]                       # (E, 4H)
    whh0 = w_ref[E:E + H, :]                   # (H, 4H)
    w1 = w_ref[E + H:E + 3 * H, :]             # (2H, 4H) = [Wih1; Whh1] stacked
    b0 = b01_ref[0:1, :]                       # (1, 4H) f32
    b1 = b01_ref[1:2, :]                       # (1, 4H) f32

    # Hoisted loop invariants.
    lens_b = jnp.broadcast_to(len_ref[...], (Bb, H))                  # int32
    lane = lax.broadcasted_iota(jnp.int32, (Bb, 4 * H), 1)
    g_lane = (lane >= 2 * H) & (lane < 3 * H)   # tanh lanes of [i, f, g, o]

    def gate_math(gates, c):
        # Full-width (Bb, 4H) activation: 2 EUP passes + 1 select instead of 4 sub-width
        # slices feeding the EUP; the i/f/g/o slices below are plain lane selects.
        act = jnp.where(g_lane, jnp.tanh(gates), jax.nn.sigmoid(gates))
        i = act[:, 0:H]
        f = act[:, H:2 * H]
        g = act[:, 2 * H:3 * H]
        o = act[:, 3 * H:4 * H]
        c_new = f * c + i * g
        return o * jnp.tanh(c_new), c_new

    # ---------- Layer 0 input-hidden gates: one big bf16 MXU matmul for all T steps. ----
    x2d = x_ref[...].reshape(T * Bb, E)                               # bf16
    g_ih0 = (jnp.dot(x2d, wih0, preferred_element_type=f32) + b0
             ).reshape(T, Bb, 4 * H)                                  # f32

    # ---------- Interleaved recurrence: layer-0 step t feeds layer-1 step t directly ----
    # (no y0 materialization; the unrolled dataflow lets the scheduler overlap
    #  layer-0 step t+1 with layer-1 step t).
    h0 = jnp.zeros((Bb, H), f32)
    c0 = jnp.zeros((Bb, H), f32)
    h1 = jnp.zeros((Bb, H), f32)
    c1 = jnp.zeros((Bb, H), f32)
    rmax = jnp.full((Bb, H), -jnp.inf, f32)
    rsum = jnp.zeros((Bb, H), f32)

    for t in range(T):                         # static unroll (short, fixed T)
        m = lens_b > t                         # valid-timestep mask
        # layer 0: hoisted IH gates + recurrent dot
        g0 = g_ih0[t] + jnp.dot(h0.astype(bf16), whh0, preferred_element_type=f32)
        h0n, c0n = gate_math(g0, c0)
        h0 = jnp.where(m, h0n, h0)
        c0 = jnp.where(m, c0n, c0)
        y0 = jnp.where(m, h0, 0.0)
        # layer 1: fused single dot [y0 | h1] @ [Wih1; Whh1]  (K = 2H)
        yh = jnp.concatenate([y0, h1], axis=1).astype(bf16)           # (Bb, 2H)
        g1 = jnp.dot(yh, w1, preferred_element_type=f32) + b1
        h1n, c1n = gate_math(g1, c1)
        h1 = jnp.where(m, h1n, h1)
        c1 = jnp.where(m, c1n, c1)
        y1 = jnp.where(m, h1, 0.0)             # padded rows of out_pad are 0
        rmax = jnp.maximum(rmax, y1)
        rsum = rsum + y1

    mean = rsum * (1.0 / T)                    # mean over padded T (torch.mean)
    last = jnp.where(lens_b > (T - 1), h1, 0.0)    # out_pad[:, -1, :]

    # ---------- concat-pool head without a lane concatenate:
    #            (3H, H) concat_fc weight split into three (H, H) blocks. ----------
    z = (jnp.dot(rmax.astype(bf16), wc_ref[0:H, :], preferred_element_type=f32)
         + jnp.dot(mean.astype(bf16), wc_ref[H:2 * H, :], preferred_element_type=f32)
         + jnp.dot(last.astype(bf16), wc_ref[2 * H:3 * H, :], preferred_element_type=f32)
         + bc_ref[...])
    z = jnp.maximum(z, 0.0)                    # eval BatchNorm already folded into wc/bc

    # classifier head (lane-dense 128-wide padded output block, sliced in the wrapper)
    out_ref[...] = (jnp.dot(z.astype(bf16), wf_ref[...], preferred_element_type=f32)
                    + bf_ref[...])


def pack_params(params):
    """One-time parameter packing (outside the per-call path)."""
    E = params['wih0_t'].shape[0]
    H = params['whh0_t'].shape[0]
    n_out = params['wf_t'].shape[1]
    assert E % 16 == 0 and H % 16 == 0, "E and H must be bf16 sublane multiples"
    Np = ((n_out + 127) // 128) * 128
    bf16 = jnp.bfloat16

    # LSTM weight slab [Wih0; Whh0; Wih1; Whh1] -> single bf16 operand; Wih1/Whh1 are
    # adjacent so the kernel's fused layer-1 dot uses rows [E+H : E+3H] directly.
    w_lstm = jnp.concatenate([params['wih0_t'], params['whh0_t'],
                              params['wih1_t'], params['whh1_t']], axis=0).astype(bf16)
    b01 = jnp.concatenate([params['b0'], params['b1']], axis=0).astype(jnp.float32)

    # Fold eval-mode BatchNorm1d into the concat_fc Linear.
    s = params['bn_gamma'] * lax.rsqrt(params['bn_var'] + 1e-5)             # (1, H)
    wc_eff = (params['wc_t'] * s).astype(bf16)                              # (3H, H)
    bc_eff = ((params['bc'] - params['bn_mean']) * s
              + params['bn_beta']).astype(jnp.float32)                      # (1, H)

    # Lane-pad the classifier head to 128 (padded columns are zero -> sliced off later).
    wf = jnp.pad(params['wf_t'], ((0, 0), (0, Np - n_out))).astype(bf16)
    bf = jnp.pad(params['bf'], ((0, 0), (0, Np - n_out))).astype(jnp.float32)

    return dict(w_lstm=w_lstm, b01=b01, wc=wc_eff, bc=bc_eff, wf=wf, bf=bf)


@functools.partial(jax.jit, static_argnames=("n_out",))
def lstm_ecg_forward(x, seq_lens, packed, *, n_out):
    """x: (B, T, E) float32, seq_lens: (B,) int (sorted desc, max == T)."""
    B, T, E = x.shape
    H = packed['wc'].shape[1]
    Np = packed['wf'].shape[1]

    # Batch block: 8 sublanes when a single block suffices, else 16 (bf16 sublane tile)
    # so the batch grid axis can shard blocks across v7x's two TensorCores.
    Bb = 8 if B <= 8 else 16
    Bp = ((B + Bb - 1) // Bb) * Bb
    nb = Bp // Bb

    # time-major + batch-pad inside this jit (fused by XLA, no extra HBM round-trip);
    # bf16 activations for the MXU.
    x3 = jnp.transpose(x, (1, 0, 2))                                  # (T, B, E)
    x3 = jnp.pad(x3, ((0, 0), (0, Bp - B), (0, 0))).astype(jnp.bfloat16)
    lens = jnp.pad(seq_lens.astype(jnp.int32), (0, Bp - B)).reshape(Bp, 1)

    kernel = functools.partial(lstm_ecg_kernel, T, E, H)
    out = pl.pallas_call(
        kernel,
        out_shape=jax.ShapeDtypeStruct((Bp, Np), jnp.float32),
        grid=(nb,),
        in_specs=[
            pl.BlockSpec((T, Bb, E), lambda b: (0, b, 0)),            # x, batch-tiled
            pl.BlockSpec((Bb, 1), lambda b: (b, 0)),                  # seq lens
            pl.BlockSpec(packed['w_lstm'].shape, lambda b: (0, 0)),   # resident weights
            pl.BlockSpec(packed['b01'].shape, lambda b: (0, 0)),
            pl.BlockSpec(packed['wc'].shape, lambda b: (0, 0)),
            pl.BlockSpec(packed['bc'].shape, lambda b: (0, 0)),
            pl.BlockSpec(packed['wf'].shape, lambda b: (0, 0)),
            pl.BlockSpec(packed['bf'].shape, lambda b: (0, 0)),
        ],
        out_specs=pl.BlockSpec((Bb, Np), lambda b: (b, 0)),
        compiler_params=pltpu.CompilerParams(
            dimension_semantics=("parallel",)),                        # megacore on v7x
    )(x3, lens, packed['w_lstm'], packed['b01'],
      packed['wc'], packed['bc'], packed['wf'], packed['bf'])
    return out[:B, :n_out]


def init_params(key, E, H, n_out):
    ks = jax.random.split(key, 10)
    rnd = lambda k, shape: 0.1 * jax.random.normal(k, shape, jnp.float32)
    idx = jnp.arange(H, dtype=jnp.float32).reshape(1, H)
    return dict(
        wih0_t=rnd(ks[0], (E, 4 * H)),
        whh0_t=rnd(ks[1], (H, 4 * H)),
        b0=rnd(ks[2], (1, 4 * H)),            # b_ih + b_hh folded
        wih1_t=rnd(ks[3], (H, 4 * H)),
        whh1_t=rnd(ks[4], (H, 4 * H)),
        b1=rnd(ks[5], (1, 4 * H)),
        wc_t=rnd(ks[6], (3 * H, H)),
        bc=rnd(ks[7], (1, H)),
        bn_gamma=1.0 + 0.05 * idx / H,
        bn_beta=0.01 * idx,
        bn_mean=0.02 * jnp.sin(idx),
        bn_var=1.0 + 0.1 * jnp.cos(idx) ** 2,
        wf_t=rnd(ks[8], (H, n_out)),
        bf=rnd(ks[9], (1, n_out)),
    )


def ref_forward(x, seq_lens, p):
    """Pure-JAX f32 reference with the original module's semantics (for validation)."""
    B, T, E = x.shape
    H = p['whh0_t'].shape[0]

    def cell(xt, h, c, wih_t, whh_t, b):
        gates = xt @ wih_t + h @ whh_t + b
        i = jax.nn.sigmoid(gates[:, :H]); f = jax.nn.sigmoid(gates[:, H:2 * H])
        g = jnp.tanh(gates[:, 2 * H:3 * H]); o = jax.nn.sigmoid(gates[:, 3 * H:])
        c = f * c + i * g
        return o * jnp.tanh(c), c

    h0 = c0 = h1 = c1 = jnp.zeros((B, H), jnp.float32)
    outs = []
    for t in range(T):
        m = seq_lens[:, None] > t
        h0n, c0n = cell(x[:, t, :], h0, c0, p['wih0_t'], p['whh0_t'], p['b0'])
        h0 = jnp.where(m, h0n, h0); c0 = jnp.where(m, c0n, c0)
        y0 = jnp.where(m, h0, 0.0)
        h1n, c1n = cell(y0, h1, c1, p['wih1_t'], p['whh1_t'], p['b1'])
        h1 = jnp.where(m, h1n, h1); c1 = jnp.where(m, c1n, c1)
        outs.append(jnp.where(m, h1, 0.0))
    out_pad = jnp.stack(outs, axis=1)
    feats = jnp.concatenate([out_pad.max(axis=1), out_pad.mean(axis=1),
                             out_pad[:, -1, :]], axis=-1)
    z = feats @ p['wc_t'] + p['bc']
    z = (z - p['bn_mean']) * lax.rsqrt(p['bn_var'] + 1e-5) * p['bn_gamma'] + p['bn_beta']
    z = jnp.maximum(z, 0.0)
    return z @ p['wf_t'] + p['bf']


if __name__ == "__main__":
    # config: n_embed=16, n_hidden=32, n_layers=2, b_dir=False,
    #         concat_pool=True, n_output=5, fc_drop irrelevant in eval.
    B, T, E, H, N_OUT = 4, 8, 16, 32, 5

    key = jax.random.PRNGKey(0)
    k_x, k_p = jax.random.split(key)
    x = jax.random.normal(k_x, (B, T, E), jnp.float32)
    seq_lens = jnp.array([8, 8, 6, 4], jnp.int32)   # sorted desc, max == T
    params = init_params(k_p, E, H, N_OUT)
    packed = pack_params(params)

    out = lstm_ecg_forward(x, seq_lens, packed, n_out=N_OUT)
    out = jax.block_until_ready(out)

    ref = ref_forward(x, seq_lens, params)
    assert out.shape == (B, N_OUT)
    max_err = float(jnp.max(jnp.abs(out - ref)))
    # bf16 MXU operands (f32 accumulation) vs. f32 reference -> loosened tolerance.
    assert jnp.allclose(out, ref, rtol=5e-2, atol=5e-2), (max_err, out, ref)
    print("KERNEL_OK")
</pallas_src>

<mosaic_0001>
module attributes {stable_mosaic.version = 11 : i64} {
  func.func @lstm_ecg_kernel(%arg0: i32, %arg1: memref<8x8x16xbf16, #tpu.memory_space<vmem>>, %arg2: memref<8x1xi32, #tpu.memory_space<vmem>>, %arg3: memref<112x128xbf16, #tpu.memory_space<vmem>>, %arg4: memref<2x128xf32, #tpu.memory_space<vmem>>, %arg5: memref<96x32xbf16, #tpu.memory_space<vmem>>, %arg6: memref<1x32xf32, #tpu.memory_space<vmem>>, %arg7: memref<32x128xbf16, #tpu.memory_space<vmem>>, %arg8: memref<1x128xf32, #tpu.memory_space<vmem>>, %arg9: memref<8x128xf32, #tpu.memory_space<vmem>>) attributes {dimension_semantics = [#tpu.dimension_semantics<parallel>], iteration_bounds = array<i64: 1>, scalar_prefetch = 0 : i64, scratch_operands = 0 : i64, tpu.core_type = #tpu.core_type<tc>, window_params = [{transform_indices = @transform_0, window_bounds = array<i64: 8, 8, 16>}, {transform_indices = @transform_1, window_bounds = array<i64: 8, 1>}, {pipeline_mode = #tpu.pipeline_mode<synchronous>, transform_indices = @transform_2, window_bounds = array<i64: 112, 128>}, {pipeline_mode = #tpu.pipeline_mode<synchronous>, transform_indices = @transform_3, window_bounds = array<i64: 2, 128>}, {pipeline_mode = #tpu.pipeline_mode<synchronous>, transform_indices = @transform_4, window_bounds = array<i64: 96, 32>}, {pipeline_mode = #tpu.pipeline_mode<synchronous>, transform_indices = @transform_5, window_bounds = array<i64: 1, 32>}, {pipeline_mode = #tpu.pipeline_mode<synchronous>, transform_indices = @transform_6, window_bounds = array<i64: 32, 128>}, {pipeline_mode = #tpu.pipeline_mode<synchronous>, transform_indices = @transform_7, window_bounds = array<i64: 1, 128>}, {transform_indices = @transform_8, window_bounds = array<i64: 8, 128>}]} {
    %c0 = arith.constant 0 : index
    %c0_0 = arith.constant 0 : index
    %0 = vector.load %arg3[%c0, %c0_0] : memref<112x128xbf16, #tpu.memory_space<vmem>>, vector<16x128xbf16>
    %c16 = arith.constant 16 : index
    %c0_1 = arith.constant 0 : index
    %1 = vector.load %arg3[%c16, %c0_1] : memref<112x128xbf16, #tpu.memory_space<vmem>>, vector<32x128xbf16>
    %c48 = arith.constant 48 : index
    %c0_2 = arith.constant 0 : index
    %2 = vector.load %arg3[%c48, %c0_2] : memref<112x128xbf16, #tpu.memory_space<vmem>>, vector<64x128xbf16>
    %c0_3 = arith.constant 0 : index
    %c0_4 = arith.constant 0 : index
    %3 = vector.load %arg4[%c0_3, %c0_4] : memref<2x128xf32, #tpu.memory_space<vmem>>, vector<1x128xf32>
    %c1 = arith.constant 1 : index
    %c0_5 = arith.constant 0 : index
    %4 = vector.load %arg4[%c1, %c0_5] : memref<2x128xf32, #tpu.memory_space<vmem>>, vector<1x128xf32>
    %c0_6 = arith.constant 0 : index
    %c0_7 = arith.constant 0 : index
    %5 = vector.load %arg2[%c0_6, %c0_7] : memref<8x1xi32, #tpu.memory_space<vmem>>, vector<8x1xi32>
    %6 = vector.shape_cast %5 : vector<8x1xi32> to vector<8x1xi32>
    %7 = vector.broadcast %6 : vector<8x1xi32> to vector<8x32xi32>
    %8 = tpu.iota {dimensions = array<i32: 1>} : vector<8x128xi32>
    %c64_i32 = arith.constant 64 : i32
    %9 = vector.broadcast %c64_i32 : i32 to vector<8x128xi32>
    %10 = arith.cmpi sge, %8, %9 : vector<8x128xi32>
    %c96_i32 = arith.constant 96 : i32
    %11 = vector.broadcast %c96_i32 : i32 to vector<8x128xi32>
    %12 = arith.cmpi slt, %8, %11 : vector<8x128xi32>
    %13 = arith.andi %10, %12 : vector<8x128xi1>
    %c0_8 = arith.constant 0 : index
    %c0_9 = arith.constant 0 : index
    %c0_10 = arith.constant 0 : index
    %14 = vector.load %arg1[%c0_8, %c0_9, %c0_10] : memref<8x8x16xbf16, #tpu.memory_space<vmem>>, vector<8x8x16xbf16>
    %15 = vector.shape_cast %14 : vector<8x8x16xbf16> to vector<64x16xbf16>
    %cst = arith.constant dense<0.000000e+00> : vector<64x128xf32>
    %16 = tpu.matmul %15, %0, %cst {dimension_numbers = #tpu.dot_dimension_numbers<[1], [0], [0], [1], [0, 0, 1, 1], [], []>} : vector<64x16xbf16>, vector<16x128xbf16>, vector<64x128xf32> -> vector<64x128xf32>
    %17 = vector.broadcast %3 : vector<1x128xf32> to vector<64x128xf32>
    %18 = arith.addf %16, %17 : vector<64x128xf32>
    %19 = vector.shape_cast %18 : vector<64x128xf32> to vector<8x8x128xf32>
    %cst_11 = arith.constant 0.000000e+00 : f32
    %20 = vector.broadcast %cst_11 : f32 to vector<8x32xf32>
    %cst_12 = arith.constant 0.000000e+00 : f32
    %21 = vector.broadcast %cst_12 : f32 to vector<8x32xf32>
    %cst_13 = arith.constant 0.000000e+00 : f32
    %22 = vector.broadcast %cst_13 : f32 to vector<8x32xf32>
    %cst_14 = arith.constant 0.000000e+00 : f32
    %23 = vector.broadcast %cst_14 : f32 to vector<8x32xf32>
    %cst_15 = arith.constant 0xFF800000 : f32
    %24 = vector.broadcast %cst_15 : f32 to vector<8x32xf32>
    %cst_16 = arith.constant 0.000000e+00 : f32
    %25 = vector.broadcast %cst_16 : f32 to vector<8x32xf32>
    %c0_i32 = arith.constant 0 : i32
    %26 = vector.broadcast %c0_i32 : i32 to vector<8x32xi32>
    %27 = arith.cmpi sgt, %7, %26 : vector<8x32xi32>
    %28 = vector.extract_strided_slice %19 {offsets = [0, 0, 0], sizes = [1, 8, 128], strides = [1, 1, 1]} : vector<8x8x128xf32> to vector<1x8x128xf32>
    %29 = vector.shape_cast %28 : vector<1x8x128xf32> to vector<8x128xf32>
    %30 = arith.truncf %20 : vector<8x32xf32> to vector<8x32xbf16>
    %cst_17 = arith.constant dense<0.000000e+00> : vector<8x128xf32>
    %31 = tpu.matmul %30, %1, %cst_17 {dimension_numbers = #tpu.dot_dimension_numbers<[1], [0], [0], [1], [0, 0, 1, 1], [], []>} : vector<8x32xbf16>, vector<32x128xbf16>, vector<8x128xf32> -> vector<8x128xf32>
    %32 = arith.addf %29, %31 : vector<8x128xf32>
    %33 = math.tanh %32 : vector<8x128xf32>
    %34 = arith.negf %32 : vector<8x128xf32>
    %35 = math.exp %34 : vector<8x128xf32>
    %cst_18 = arith.constant 1.000000e+00 : f32
    %36 = vector.broadcast %cst_18 : f32 to vector<8x128xf32>
    %37 = arith.addf %36, %35 : vector<8x128xf32>
    %38 = arith.divf %36, %37 : vector<8x128xf32>
    %39 = arith.select %13, %33, %38 : vector<8x128xi1>, vector<8x128xf32>
    %40 = vector.extract_strided_slice %39 {offsets = [0, 0], sizes = [8, 32], strides = [1, 1]} : vector<8x128xf32> to vector<8x32xf32>
    %41 = vector.extract_strided_slice %39 {offsets = [0, 32], sizes = [8, 32], strides = [1, 1]} : vector<8x128xf32> to vector<8x32xf32>
    %42 = vector.extract_strided_slice %39 {offsets = [0, 64], sizes = [8, 32], strides = [1, 1]} : vector<8x128xf32> to vector<8x32xf32>
    %43 = vector.extract_strided_slice %39 {offsets = [0, 96], sizes = [8, 32], strides = [1, 1]} : vector<8x128xf32> to vector<8x32xf32>
    %44 = arith.mulf %41, %21 : vector<8x32xf32>
    %45 = arith.mulf %40, %42 : vector<8x32xf32>
    %46 = arith.addf %44, %45 : vector<8x32xf32>
    %47 = math.tanh %46 : vector<8x32xf32>
    %48 = arith.mulf %43, %47 : vector<8x32xf32>
    %49 = arith.select %27, %48, %20 : vector<8x32xi1>, vector<8x32xf32>
    %50 = arith.select %27, %46, %21 : vector<8x32xi1>, vector<8x32xf32>
    %cst_19 = arith.constant 0.000000e+00 : f32
    %51 = vector.broadcast %cst_19 : f32 to vector<8x32xf32>
    %52 = arith.select %27, %49, %51 : vector<8x32xi1>, vector<8x32xf32>
    %53 = tpu.concatenate %52, %22 in 1 : vector<8x32xf32>, vector<8x32xf32> -> vector<8x64xf32>
    %54 = arith.truncf %53 : vector<8x64xf32> to vector<8x64xbf16>
    %cst_20 = arith.constant dense<0.000000e+00> : vector<8x128xf32>
    %55 = tpu.matmul %54, %2, %cst_20 {dimension_numbers = #tpu.dot_dimension_numbers<[1], [0], [0], [1], [0, 0, 1, 1], [], []>} : vector<8x64xbf16>, vector<64x128xbf16>, vector<8x128xf32> -> vector<8x128xf32>
    %56 = vector.broadcast %4 : vector<1x128xf32> to vector<8x128xf32>
    %57 = arith.addf %55, %56 : vector<8x128xf32>
    %58 = math.tanh %57 : vector<8x128xf32>
    %59 = arith.negf %57 : vector<8x128xf32>
    %60 = math.exp %59 : vector<8x128xf32>
    %cst_21 = arith.constant 1.000000e+00 : f32
    %61 = vector.broadcast %cst_21 : f32 to vector<8x128xf32>
    %62 = arith.addf %61, %60 : vector<8x128xf32>
    %63 = arith.divf %61, %62 : vector<8x128xf32>
    %64 = arith.select %13, %58, %63 : vector<8x128xi1>, vector<8x128xf32>
    %65 = vector.extract_strided_slice %64 {offsets = [0, 0], sizes = [8, 32], strides = [1, 1]} : vector<8x128xf32> to vector<8x32xf32>
    %66 = vector.extract_strided_slice %64 {offsets = [0, 32], sizes = [8, 32], strides = [1, 1]} : vector<8x128xf32> to vector<8x32xf32>
    %67 = vector.extract_strided_slice %64 {offsets = [0, 64], sizes = [8, 32], strides = [1, 1]} : vector<8x128xf32> to vector<8x32xf32>
    %68 = vector.extract_strided_slice %64 {offsets = [0, 96], sizes = [8, 32], strides = [1, 1]} : vector<8x128xf32> to vector<8x32xf32>
    %69 = arith.mulf %66, %23 : vector<8x32xf32>
    %70 = arith.mulf %65, %67 : vector<8x32xf32>
    %71 = arith.addf %69, %70 : vector<8x32xf32>
    %72 = math.tanh %71 : vector<8x32xf32>
    %73 = arith.mulf %68, %72 : vector<8x32xf32>
    %74 = arith.select %27, %73, %22 : vector<8x32xi1>, vector<8x32xf32>
    %75 = arith.select %27, %71, %23 : vector<8x32xi1>, vector<8x32xf32>
    %cst_22 = arith.constant 0.000000e+00 : f32
    %76 = vector.broadcast %cst_22 : f32 to vector<8x32xf32>
    %77 = arith.select %27, %74, %76 : vector<8x32xi1>, vector<8x32xf32>
    %78 = arith.maximumf %24, %77 : vector<8x32xf32>
    %79 = arith.addf %25, %77 : vector<8x32xf32>
    %c1_i32 = arith.constant 1 : i32
    %80 = vector.broadcast %c1_i32 : i32 to vector<8x32xi32>
    %81 = arith.cmpi sgt, %7, %80 : vector<8x32xi32>
    %82 = vector.extract_strided_slice %19 {offsets = [1, 0, 0], sizes = [1, 8, 128], strides = [1, 1, 1]} : vector<8x8x128xf32> to vector<1x8x128xf32>
    %83 = vector.shape_cast %82 : vector<1x8x128xf32> to vector<8x128xf32>
    %84 = arith.truncf %49 : vector<8x32xf32> to vector<8x32xbf16>
    %cst_23 = arith.constant dense<0.000000e+00> : vector<8x128xf32>
    %85 = tpu.matmul %84, %1, %cst_23 {dimension_numbers = #tpu.dot_dimension_numbers<[1], [0], [0], [1], [0, 0, 1, 1], [], []>} : vector<8x32xbf16>, vector<32x128xbf16>, vector<8x128xf32> -> vector<8x128xf32>
    %86 = arith.addf %83, %85 : vector<8x128xf32>
    %87 = math.tanh %86 : vector<8x128xf32>
    %88 = arith.negf %86 : vector<8x128xf32>
    %89 = math.exp %88 : vector<8x128xf32>
    %cst_24 = arith.constant 1.000000e+00 : f32
    %90 = vector.broadcast %cst_24 : f32 to vector<8x128xf32>
    %91 = arith.addf %90, %89 : vector<8x128xf32>
    %92 = arith.divf %90, %91 : vector<8x128xf32>
    %93 = arith.select %13, %87, %92 : vector<8x128xi1>, vector<8x128xf32>
    %94 = vector.extract_strided_slice %93 {offsets = [0, 0], sizes = [8, 32], strides = [1, 1]} : vector<8x128xf32> to vector<8x32xf32>
    %95 = vector.extract_strided_slice %93 {offsets = [0, 32], sizes = [8, 32], strides = [1, 1]} : vector<8x128xf32> to vector<8x32xf32>
    %96 = vector.extract_strided_slice %93 {offsets = [0, 64], sizes = [8, 32], strides = [1, 1]} : vector<8x128xf32> to vector<8x32xf32>
    %97 = vector.extract_strided_slice %93 {offsets = [0, 96], sizes = [8, 32], strides = [1, 1]} : vector<8x128xf32> to vector<8x32xf32>
    %98 = arith.mulf %95, %50 : vector<8x32xf32>
    %99 = arith.mulf %94, %96 : vector<8x32xf32>
    %100 = arith.addf %98, %99 : vector<8x32xf32>
    %101 = math.tanh %100 : vector<8x32xf32>
    %102 = arith.mulf %97, %101 : vector<8x32xf32>
    %103 = arith.select %81, %102, %49 : vector<8x32xi1>, vector<8x32xf32>
    %104 = arith.select %81, %100, %50 : vector<8x32xi1>, vector<8x32xf32>
    %cst_25 = arith.constant 0.000000e+00 : f32
    %105 = vector.broadcast %cst_25 : f32 to vector<8x32xf32>
    %106 = arith.select %81, %103, %105 : vector<8x32xi1>, vector<8x32xf32>
    %107 = tpu.concatenate %106, %74 in 1 : vector<8x32xf32>, vector<8x32xf32> -> vector<8x64xf32>
    %108 = arith.truncf %107 : vector<8x64xf32> to vector<8x64xbf16>
    %cst_26 = arith.constant dense<0.000000e+00> : vector<8x128xf32>
    %109 = tpu.matmul %108, %2, %cst_26 {dimension_numbers = #tpu.dot_dimension_numbers<[1], [0], [0], [1], [0, 0, 1, 1], [], []>} : vector<8x64xbf16>, vector<64x128xbf16>, vector<8x128xf32> -> vector<8x128xf32>
    %110 = vector.broadcast %4 : vector<1x128xf32> to vector<8x128xf32>
    %111 = arith.addf %109, %110 : vector<8x128xf32>
    %112 = math.tanh %111 : vector<8x128xf32>
    %113 = arith.negf %111 : vector<8x128xf32>
    %114 = math.exp %113 : vector<8x128xf32>
    %cst_27 = arith.constant 1.000000e+00 : f32
    %115 = vector.broadcast %cst_27 : f32 to vector<8x128xf32>
    %116 = arith.addf %115, %114 : vector<8x128xf32>
    %117 = arith.divf %115, %116 : vector<8x128xf32>
    %118 = arith.select %13, %112, %117 : vector<8x128xi1>, vector<8x128xf32>
    %119 = vector.extract_strided_slice %118 {offsets = [0, 0], sizes = [8, 32], strides = [1, 1]} : vector<8x128xf32> to vector<8x32xf32>
    %120 = vector.extract_strided_slice %118 {offsets = [0, 32], sizes = [8, 32], strides = [1, 1]} : vector<8x128xf32> to vector<8x32xf32>
    %121 = vector.extract_strided_slice %118 {offsets = [0, 64], sizes = [8, 32], strides = [1, 1]} : vector<8x128xf32> to vector<8x32xf32>
    %122 = vector.extract_strided_slice %118 {offsets = [0, 96], sizes = [8, 32], strides = [1, 1]} : vector<8x128xf32> to vector<8x32xf32>
    %123 = arith.mulf %120, %75 : vector<8x32xf32>
    %124 = arith.mulf %119, %121 : vector<8x32xf32>
    %125 = arith.addf %123, %124 : vector<8x32xf32>
    %126 = math.tanh %125 : vector<8x32xf32>
    %127 = arith.mulf %122, %126 : vector<8x32xf32>
    %128 = arith.select %81, %127, %74 : vector<8x32xi1>, vector<8x32xf32>
    %129 = arith.select %81, %125, %75 : vector<8x32xi1>, vector<8x32xf32>
    %cst_28 = arith.constant 0.000000e+00 : f32
    %130 = vector.broadcast %cst_28 : f32 to vector<8x32xf32>
    %131 = arith.select %81, %128, %130 : vector<8x32xi1>, vector<8x32xf32>
    %132 = arith.maximumf %78, %131 : vector<8x32xf32>
    %133 = arith.addf %79, %131 : vector<8x32xf32>
    %c2_i32 = arith.constant 2 : i32
    %134 = vector.broadcast %c2_i32 : i32 to vector<8x32xi32>
    %135 = arith.cmpi sgt, %7, %134 : vector<8x32xi32>
    %136 = vector.extract_strided_slice %19 {offsets = [2, 0, 0], sizes = [1, 8, 128], strides = [1, 1, 1]} : vector<8x8x128xf32> to vector<1x8x128xf32>
    %137 = vector.shape_cast %136 : vector<1x8x128xf32> to vector<8x128xf32>
    %138 = arith.truncf %103 : vector<8x32xf32> to vector<8x32xbf16>
    %cst_29 = arith.constant dense<0.000000e+00> : vector<8x128xf32>
    %139 = tpu.matmul %138, %1, %cst_29 {dimension_numbers = #tpu.dot_dimension_numbers<[1], [0], [0], [1], [0, 0, 1, 1], [], []>} : vector<8x32xbf16>, vector<32x128xbf16>, vector<8x128xf32> -> vector<8x128xf32>
    %140 = arith.addf %137, %139 : vector<8x128xf32>
    %141 = math.tanh %140 : vector<8x128xf32>
    %142 = arith.negf %140 : vector<8x128xf32>
    %143 = math.exp %142 : vector<8x128xf32>
    %cst_30 = arith.constant 1.000000e+00 : f32
    %144 = vector.broadcast %cst_30 : f32 to vector<8x128xf32>
    %145 = arith.addf %144, %143 : vector<8x128xf32>
    %146 = arith.divf %144, %145 : vector<8x128xf32>
    %147 = arith.select %13, %141, %146 : vector<8x128xi1>, vector<8x128xf32>
    %148 = vector.extract_strided_slice %147 {offsets = [0, 0], sizes = [8, 32], strides = [1, 1]} : vector<8x128xf32> to vector<8x32xf32>
    %149 = vector.extract_strided_slice %147 {offsets = [0, 32], sizes = [8, 32], strides = [1, 1]} : vector<8x128xf32> to vector<8x32xf32>
    %150 = vector.extract_strided_slice %147 {offsets = [0, 64], sizes = [8, 32], strides = [1, 1]} : vector<8x128xf32> to vector<8x32xf32>
    %151 = vector.extract_strided_slice %147 {offsets = [0, 96], sizes = [8, 32], strides = [1, 1]} : vector<8x128xf32> to vector<8x32xf32>
    %152 = arith.mulf %149, %104 : vector<8x32xf32>
    %153 = arith.mulf %148, %150 : vector<8x32xf32>
    %154 = arith.addf %152, %153 : vector<8x32xf32>
    %155 = math.tanh %154 : vector<8x32xf32>
    %156 = arith.mulf %151, %155 : vector<8x32xf32>
    %157 = arith.select %135, %156, %103 : vector<8x32xi1>, vector<8x32xf32>
    %158 = arith.select %135, %154, %104 : vector<8x32xi1>, vector<8x32xf32>
    %cst_31 = arith.constant 0.000000e+00 : f32
    %159 = vector.broadcast %cst_31 : f32 to vector<8x32xf32>
    %160 = arith.select %135, %157, %159 : vector<8x32xi1>, vector<8x32xf32>
    %161 = tpu.concatenate %160, %128 in 1 : vector<8x32xf32>, vector<8x32xf32> -> vector<8x64xf32>
    %162 = arith.truncf %161 : vector<8x64xf32> to vector<8x64xbf16>
    %cst_32 = arith.constant dense<0.000000e+00> : vector<8x128xf32>
    %163 = tpu.matmul %162, %2, %cst_32 {dimension_numbers = #tpu.dot_dimension_numbers<[1], [0], [0], [1], [0, 0, 1, 1], [], []>} : vector<8x64xbf16>, vector<64x128xbf16>, vector<8x128xf32> -> vector<8x128xf32>
    %164 = vector.broadcast %4 : vector<1x128xf32> to vector<8x128xf32>
    %165 = arith.addf %163, %164 : vector<8x128xf32>
    %166 = math.tanh %165 : vector<8x128xf32>
    %167 = arith.negf %165 : vector<8x128xf32>
    %168 = math.exp %167 : vector<8x128xf32>
    %cst_33 = arith.constant 1.000000e+00 : f32
    %169 = vector.broadcast %cst_33 : f32 to vector<8x128xf32>
    %170 = arith.addf %169, %168 : vector<8x128xf32>
    %171 = arith.divf %169, %170 : vector<8x128xf32>
    %172 = arith.select %13, %166, %171 : vector<8x128xi1>, vector<8x128xf32>
    %173 = vector.extract_strided_slice %172 {offsets = [0, 0], sizes = [8, 32], strides = [1, 1]} : vector<8x128xf32> to vector<8x32xf32>
    %174 = vector.extract_strided_slice %172 {offsets = [0, 32], sizes = [8, 32], strides = [1, 1]} : vector<8x128xf32> to vector<8x32xf32>
    %175 = vector.extract_strided_slice %172 {offsets = [0, 64], sizes = [8, 32], strides = [1, 1]} : vector<8x128xf32> to vector<8x32xf32>
    %176 = vector.extract_strided_slice %172 {offsets = [0, 96], sizes = [8, 32], strides = [1, 1]} : vector<8x128xf32> to vector<8x32xf32>
    %177 = arith.mulf %174, %129 : vector<8x32xf32>
    %178 = arith.mulf %173, %175 : vector<8x32xf32>
    %179 = arith.addf %177, %178 : vector<8x32xf32>
    %180 = math.tanh %179 : vector<8x32xf32>
    %181 = arith.mulf %176, %180 : vector<8x32xf32>
    %182 = arith.select %135, %181, %128 : vector<8x32xi1>, vector<8x32xf32>
    %183 = arith.select %135, %179, %129 : vector<8x32xi1>, vector<8x32xf32>
    %cst_34 = arith.constant 0.000000e+00 : f32
    %184 = vector.broadcast %cst_34 : f32 to vector<8x32xf32>
    %185 = arith.select %135, %182, %184 : vector<8x32xi1>, vector<8x32xf32>
    %186 = arith.maximumf %132, %185 : vector<8x32xf32>
    %187 = arith.addf %133, %185 : vector<8x32xf32>
    %c3_i32 = arith.constant 3 : i32
    %188 = vector.broadcast %c3_i32 : i32 to vector<8x32xi32>
    %189 = arith.cmpi sgt, %7, %188 : vector<8x32xi32>
    %190 = vector.extract_strided_slice %19 {offsets = [3, 0, 0], sizes = [1, 8, 128], strides = [1, 1, 1]} : vector<8x8x128xf32> to vector<1x8x128xf32>
    %191 = vector.shape_cast %190 : vector<1x8x128xf32> to vector<8x128xf32>
    %192 = arith.truncf %157 : vector<8x32xf32> to vector<8x32xbf16>
    %cst_35 = arith.constant dense<0.000000e+00> : vector<8x128xf32>
    %193 = tpu.matmul %192, %1, %cst_35 {dimension_numbers = #tpu.dot_dimension_numbers<[1], [0], [0], [1], [0, 0, 1, 1], [], []>} : vector<8x32xbf16>, vector<32x128xbf16>, vector<8x128xf32> -> vector<8x128xf32>
    %194 = arith.addf %191, %193 : vector<8x128xf32>
    %195 = math.tanh %194 : vector<8x128xf32>
    %196 = arith.negf %194 : vector<8x128xf32>
    %197 = math.exp %196 : vector<8x128xf32>
    %cst_36 = arith.constant 1.000000e+00 : f32
    %198 = vector.broadcast %cst_36 : f32 to vector<8x128xf32>
    %199 = arith.addf %198, %197 : vector<8x128xf32>
    %200 = arith.divf %198, %199 : vector<8x128xf32>
    %201 = arith.select %13, %195, %200 : vector<8x128xi1>, vector<8x128xf32>
    %202 = vector.extract_strided_slice %201 {offsets = [0, 0], sizes = [8, 32], strides = [1, 1]} : vector<8x128xf32> to vector<8x32xf32>
    %203 = vector.extract_strided_slice %201 {offsets = [0, 32], sizes = [8, 32], strides = [1, 1]} : vector<8x128xf32> to vector<8x32xf32>
    %204 = vector.extract_strided_slice %201 {offsets = [0, 64], sizes = [8, 32], strides = [1, 1]} : vector<8x128xf32> to vector<8x32xf32>
    %205 = vector.extract_strided_slice %201 {offsets = [0, 96], sizes = [8, 32], strides = [1, 1]} : vector<8x128xf32> to vector<8x32xf32>
    %206 = arith.mulf %203, %158 : vector<8x32xf32>
    %207 = arith.mulf %202, %204 : vector<8x32xf32>
    %208 = arith.addf %206, %207 : vector<8x32xf32>
    %209 = math.tanh %208 : vector<8x32xf32>
    %210 = arith.mulf %205, %209 : vector<8x32xf32>
    %211 = arith.select %189, %210, %157 : vector<8x32xi1>, vector<8x32xf32>
    %212 = arith.select %189, %208, %158 : vector<8x32xi1>, vector<8x32xf32>
    %cst_37 = arith.constant 0.000000e+00 : f32
    %213 = vector.broadcast %cst_37 : f32 to vector<8x32xf32>
    %214 = arith.select %189, %211, %213 : vector<8x32xi1>, vector<8x32xf32>
    %215 = tpu.concatenate %214, %182 in 1 : vector<8x32xf32>, vector<8x32xf32> -> vector<8x64xf32>
    %216 = arith.truncf %215 : vector<8x64xf32> to vector<8x64xbf16>
    %cst_38 = arith.constant dense<0.000000e+00> : vector<8x128xf32>
    %217 = tpu.matmul %216, %2, %cst_38 {dimension_numbers = #tpu.dot_dimension_numbers<[1], [0], [0], [1], [0, 0, 1, 1], [], []>} : vector<8x64xbf16>, vector<64x128xbf16>, vector<8x128xf32> -> vector<8x128xf32>
    %218 = vector.broadcast %4 : vector<1x128xf32> to vector<8x128xf32>
    %219 = arith.addf %217, %218 : vector<8x128xf32>
    %220 = math.tanh %219 : vector<8x128xf32>
    %221 = arith.negf %219 : vector<8x128xf32>
    %222 = math.exp %221 : vector<8x128xf32>
    %cst_39 = arith.constant 1.000000e+00 : f32
    %223 = vector.broadcast %cst_39 : f32 to vector<8x128xf32>
    %224 = arith.addf %223, %222 : vector<8x128xf32>
    %225 = arith.divf %223, %224 : vector<8x128xf32>
    %226 = arith.select %13, %220, %225 : vector<8x128xi1>, vector<8x128xf32>
    %227 = vector.extract_strided_slice %226 {offsets = [0, 0], sizes = [8, 32], strides = [1, 1]} : vector<8x128xf32> to vector<8x32xf32>
    %228 = vector.extract_strided_slice %226 {offsets = [0, 32], sizes = [8, 32], strides = [1, 1]} : vector<8x128xf32> to vector<8x32xf32>
    %229 = vector.extract_strided_slice %226 {offsets = [0, 64], sizes = [8, 32], strides = [1, 1]} : vector<8x128xf32> to vector<8x32xf32>
    %230 = vector.extract_strided_slice %226 {offsets = [0, 96], sizes = [8, 32], strides = [1, 1]} : vector<8x128xf32> to vector<8x32xf32>
    %231 = arith.mulf %228, %183 : vector<8x32xf32>
    %232 = arith.mulf %227, %229 : vector<8x32xf32>
    %233 = arith.addf %231, %232 : vector<8x32xf32>
    %234 = math.tanh %233 : vector<8x32xf32>
    %235 = arith.mulf %230, %234 : vector<8x32xf32>
    %236 = arith.select %189, %235, %182 : vector<8x32xi1>, vector<8x32xf32>
    %237 = arith.select %189, %233, %183 : vector<8x32xi1>, vector<8x32xf32>
    %cst_40 = arith.constant 0.000000e+00 : f32
    %238 = vector.broadcast %cst_40 : f32 to vector<8x32xf32>
    %239 = arith.select %189, %236, %238 : vector<8x32xi1>, vector<8x32xf32>
    %240 = arith.maximumf %186, %239 : vector<8x32xf32>
    %241 = arith.addf %187, %239 : vector<8x32xf32>
    %c4_i32 = arith.constant 4 : i32
    %242 = vector.broadcast %c4_i32 : i32 to vector<8x32xi32>
    %243 = arith.cmpi sgt, %7, %242 : vector<8x32xi32>
    %244 = vector.extract_strided_slice %19 {offsets = [4, 0, 0], sizes = [1, 8, 128], strides = [1, 1, 1]} : vector<8x8x128xf32> to vector<1x8x128xf32>
    %245 = vector.shape_cast %244 : vector<1x8x128xf32> to vector<8x128xf32>
    %246 = arith.truncf %211 : vector<8x32xf32> to vector<8x32xbf16>
    %cst_41 = arith.constant dense<0.000000e+00> : vector<8x128xf32>
    %247 = tpu.matmul %246, %1, %cst_41 {dimension_numbers = #tpu.dot_dimension_numbers<[1], [0], [0], [1], [0, 0, 1, 1], [], []>} : vector<8x32xbf16>, vector<32x128xbf16>, vector<8x128xf32> -> vector<8x128xf32>
    %248 = arith.addf %245, %247 : vector<8x128xf32>
    %249 = math.tanh %248 : vector<8x128xf32>
    %250 = arith.negf %248 : vector<8x128xf32>
    %251 = math.exp %250 : vector<8x128xf32>
    %cst_42 = arith.constant 1.000000e+00 : f32
    %252 = vector.broadcast %cst_42 : f32 to vector<8x128xf32>
    %253 = arith.addf %252, %251 : vector<8x128xf32>
    %254 = arith.divf %252, %253 : vector<8x128xf32>
    %255 = arith.select %13, %249, %254 : vector<8x128xi1>, vector<8x128xf32>
    %256 = vector.extract_strided_slice %255 {offsets = [0, 0], sizes = [8, 32], strides = [1, 1]} : vector<8x128xf32> to vector<8x32xf32>
    %257 = vector.extract_strided_slice %255 {offsets = [0, 32], sizes = [8, 32], strides = [1, 1]} : vector<8x128xf32> to vector<8x32xf32>
    %258 = vector.extract_strided_slice %255 {offsets = [0, 64], sizes = [8, 32], strides = [1, 1]} : vector<8x128xf32> to vector<8x32xf32>
    %259 = vector.extract_strided_slice %255 {offsets = [0, 96], sizes = [8, 32], strides = [1, 1]} : vector<8x128xf32> to vector<8x32xf32>
    %260 = arith.mulf %257, %212 : vector<8x32xf32>
    %261 = arith.mulf %256, %258 : vector<8x32xf32>
    %262 = arith.addf %260, %261 : vector<8x32xf32>
    %263 = math.tanh %262 : vector<8x32xf32>
    %264 = arith.mulf %259, %263 : vector<8x32xf32>
    %265 = arith.select %243, %264, %211 : vector<8x32xi1>, vector<8x32xf32>
    %266 = arith.select %243, %262, %212 : vector<8x32xi1>, vector<8x32xf32>
    %cst_43 = arith.constant 0.000000e+00 : f32
    %267 = vector.broadcast %cst_43 : f32 to vector<8x32xf32>
    %268 = arith.select %243, %265, %267 : vector<8x32xi1>, vector<8x32xf32>
    %269 = tpu.concatenate %268, %236 in 1 : vector<8x32xf32>, vector<8x32xf32> -> vector<8x64xf32>
    %270 = arith.truncf %269 : vector<8x64xf32> to vector<8x64xbf16>
    %cst_44 = arith.constant dense<0.000000e+00> : vector<8x128xf32>
    %271 = tpu.matmul %270, %2, %cst_44 {dimension_numbers = #tpu.dot_dimension_numbers<[1], [0], [0], [1], [0, 0, 1, 1], [], []>} : vector<8x64xbf16>, vector<64x128xbf16>, vector<8x128xf32> -> vector<8x128xf32>
    %272 = vector.broadcast %4 : vector<1x128xf32> to vector<8x128xf32>
    %273 = arith.addf %271, %272 : vector<8x128xf32>
    %274 = math.tanh %273 : vector<8x128xf32>
    %275 = arith.negf %273 : vector<8x128xf32>
    %276 = math.exp %275 : vector<8x128xf32>
    %cst_45 = arith.constant 1.000000e+00 : f32
    %277 = vector.broadcast %cst_45 : f32 to vector<8x128xf32>
    %278 = arith.addf %277, %276 : vector<8x128xf32>
    %279 = arith.divf %277, %278 : vector<8x128xf32>
    %280 = arith.select %13, %274, %279 : vector<8x128xi1>, vector<8x128xf32>
    %281 = vector.extract_strided_slice %280 {offsets = [0, 0], sizes = [8, 32], strides = [1, 1]} : vector<8x128xf32> to vector<8x32xf32>
    %282 = vector.extract_strided_slice %280 {offsets = [0, 32], sizes = [8, 32], strides = [1, 1]} : vector<8x128xf32> to vector<8x32xf32>
    %283 = vector.extract_strided_slice %280 {offsets = [0, 64], sizes = [8, 32], strides = [1, 1]} : vector<8x128xf32> to vector<8x32xf32>
    %284 = vector.extract_strided_slice %280 {offsets = [0, 96], sizes = [8, 32], strides = [1, 1]} : vector<8x128xf32> to vector<8x32xf32>
    %285 = arith.mulf %282, %237 : vector<8x32xf32>
    %286 = arith.mulf %281, %283 : vector<8x32xf32>
    %287 = arith.addf %285, %286 : vector<8x32xf32>
    %288 = math.tanh %287 : vector<8x32xf32>
    %289 = arith.mulf %284, %288 : vector<8x32xf32>
    %290 = arith.select %243, %289, %236 : vector<8x32xi1>, vector<8x32xf32>
    %291 = arith.select %243, %287, %237 : vector<8x32xi1>, vector<8x32xf32>
    %cst_46 = arith.constant 0.000000e+00 : f32
    %292 = vector.broadcast %cst_46 : f32 to vector<8x32xf32>
    %293 = arith.select %243, %290, %292 : vector<8x32xi1>, vector<8x32xf32>
    %294 = arith.maximumf %240, %293 : vector<8x32xf32>
    %295 = arith.addf %241, %293 : vector<8x32xf32>
    %c5_i32 = arith.constant 5 : i32
    %296 = vector.broadcast %c5_i32 : i32 to vector<8x32xi32>
    %297 = arith.cmpi sgt, %7, %296 : vector<8x32xi32>
    %298 = vector.extract_strided_slice %19 {offsets = [5, 0, 0], sizes = [1, 8, 128], strides = [1, 1, 1]} : vector<8x8x128xf32> to vector<1x8x128xf32>
    %299 = vector.shape_cast %298 : vector<1x8x128xf32> to vector<8x128xf32>
    %300 = arith.truncf %265 : vector<8x32xf32> to vector<8x32xbf16>
    %cst_47 = arith.constant dense<0.000000e+00> : vector<8x128xf32>
    %301 = tpu.matmul %300, %1, %cst_47 {dimension_numbers = #tpu.dot_dimension_numbers<[1], [0], [0], [1], [0, 0, 1, 1], [], []>} : vector<8x32xbf16>, vector<32x128xbf16>, vector<8x128xf32> -> vector<8x128xf32>
    %302 = arith.addf %299, %301 : vector<8x128xf32>
    %303 = math.tanh %302 : vector<8x128xf32>
    %304 = arith.negf %302 : vector<8x128xf32>
    %305 = math.exp %304 : vector<8x128xf32>
    %cst_48 = arith.constant 1.000000e+00 : f32
    %306 = vector.broadcast %cst_48 : f32 to vector<8x128xf32>
    %307 = arith.addf %306, %305 : vector<8x128xf32>
    %308 = arith.divf %306, %307 : vector<8x128xf32>
    %309 = arith.select %13, %303, %308 : vector<8x128xi1>, vector<8x128xf32>
    %310 = vector.extract_strided_slice %309 {offsets = [0, 0], sizes = [8, 32], strides = [1, 1]} : vector<8x128xf32> to vector<8x32xf32>
    %311 = vector.extract_strided_slice %309 {offsets = [0, 32], sizes = [8, 32], strides = [1, 1]} : vector<8x128xf32> to vector<8x32xf32>
    %312 = vector.extract_strided_slice %309 {offsets = [0, 64], sizes = [8, 32], strides = [1, 1]} : vector<8x128xf32> to vector<8x32xf32>
    %313 = vector.extract_strided_slice %309 {offsets = [0, 96], sizes = [8, 32], strides = [1, 1]} : vector<8x128xf32> to vector<8x32xf32>
    %314 = arith.mulf %311, %266 : vector<8x32xf32>
    %315 = arith.mulf %310, %312 : vector<8x32xf32>
    %316 = arith.addf %314, %315 : vector<8x32xf32>
    %317 = math.tanh %316 : vector<8x32xf32>
    %318 = arith.mulf %313, %317 : vector<8x32xf32>
    %319 = arith.select %297, %318, %265 : vector<8x32xi1>, vector<8x32xf32>
    %320 = arith.select %297, %316, %266 : vector<8x32xi1>, vector<8x32xf32>
    %cst_49 = arith.constant 0.000000e+00 : f32
    %321 = vector.broadcast %cst_49 : f32 to vector<8x32xf32>
    %322 = arith.select %297, %319, %321 : vector<8x32xi1>, vector<8x32xf32>
    %323 = tpu.concatenate %322, %290 in 1 : vector<8x32xf32>, vector<8x32xf32> -> vector<8x64xf32>
    %324 = arith.truncf %323 : vector<8x64xf32> to vector<8x64xbf16>
    %cst_50 = arith.constant dense<0.000000e+00> : vector<8x128xf32>
    %325 = tpu.matmul %324, %2, %cst_50 {dimension_numbers = #tpu.dot_dimension_numbers<[1], [0], [0], [1], [0, 0, 1, 1], [], []>} : vector<8x64xbf16>, vector<64x128xbf16>, vector<8x128xf32> -> vector<8x128xf32>
    %326 = vector.broadcast %4 : vector<1x128xf32> to vector<8x128xf32>
    %327 = arith.addf %325, %326 : vector<8x128xf32>
    %328 = math.tanh %327 : vector<8x128xf32>
    %329 = arith.negf %327 : vector<8x128xf32>
    %330 = math.exp %329 : vector<8x128xf32>
    %cst_51 = arith.constant 1.000000e+00 : f32
    %331 = vector.broadcast %cst_51 : f32 to vector<8x128xf32>
    %332 = arith.addf %331, %330 : vector<8x128xf32>
    %333 = arith.divf %331, %332 : vector<8x128xf32>
    %334 = arith.select %13, %328, %333 : vector<8x128xi1>, vector<8x128xf32>
    %335 = vector.extract_strided_slice %334 {offsets = [0, 0], sizes = [8, 32], strides = [1, 1]} : vector<8x128xf32> to vector<8x32xf32>
    %336 = vector.extract_strided_slice %334 {offsets = [0, 32], sizes = [8, 32], strides = [1, 1]} : vector<8x128xf32> to vector<8x32xf32>
    %337 = vector.extract_strided_slice %334 {offsets = [0, 64], sizes = [8, 32], strides = [1, 1]} : vector<8x128xf32> to vector<8x32xf32>
    %338 = vector.extract_strided_slice %334 {offsets = [0, 96], sizes = [8, 32], strides = [1, 1]} : vector<8x128xf32> to vector<8x32xf32>
    %339 = arith.mulf %336, %291 : vector<8x32xf32>
    %340 = arith.mulf %335, %337 : vector<8x32xf32>
    %341 = arith.addf %339, %340 : vector<8x32xf32>
    %342 = math.tanh %341 : vector<8x32xf32>
    %343 = arith.mulf %338, %342 : vector<8x32xf32>
    %344 = arith.select %297, %343, %290 : vector<8x32xi1>, vector<8x32xf32>
    %345 = arith.select %297, %341, %291 : vector<8x32xi1>, vector<8x32xf32>
    %cst_52 = arith.constant 0.000000e+00 : f32
    %346 = vector.broadcast %cst_52 : f32 to vector<8x32xf32>
    %347 = arith.select %297, %344, %346 : vector<8x32xi1>, vector<8x32xf32>
    %348 = arith.maximumf %294, %347 : vector<8x32xf32>
    %349 = arith.addf %295, %347 : vector<8x32xf32>
    %c6_i32 = arith.constant 6 : i32
    %350 = vector.broadcast %c6_i32 : i32 to vector<8x32xi32>
    %351 = arith.cmpi sgt, %7, %350 : vector<8x32xi32>
    %352 = vector.extract_strided_slice %19 {offsets = [6, 0, 0], sizes = [1, 8, 128], strides = [1, 1, 1]} : vector<8x8x128xf32> to vector<1x8x128xf32>
    %353 = vector.shape_cast %352 : vector<1x8x128xf32> to vector<8x128xf32>
    %354 = arith.truncf %319 : vector<8x32xf32> to vector<8x32xbf16>
    %cst_53 = arith.constant dense<0.000000e+00> : vector<8x128xf32>
    %355 = tpu.matmul %354, %1, %cst_53 {dimension_numbers = #tpu.dot_dimension_numbers<[1], [0], [0], [1], [0, 0, 1, 1], [], []>} : vector<8x32xbf16>, vector<32x128xbf16>, vector<8x128xf32> -> vector<8x128xf32>
    %356 = arith.addf %353, %355 : vector<8x128xf32>
    %357 = math.tanh %356 : vector<8x128xf32>
    %358 = arith.negf %356 : vector<8x128xf32>
    %359 = math.exp %358 : vector<8x128xf32>
    %cst_54 = arith.constant 1.000000e+00 : f32
    %360 = vector.broadcast %cst_54 : f32 to vector<8x128xf32>
    %361 = arith.addf %360, %359 : vector<8x128xf32>
    %362 = arith.divf %360, %361 : vector<8x128xf32>
    %363 = arith.select %13, %357, %362 : vector<8x128xi1>, vector<8x128xf32>
    %364 = vector.extract_strided_slice %363 {offsets = [0, 0], sizes = [8, 32], strides = [1, 1]} : vector<8x128xf32> to vector<8x32xf32>
    %365 = vector.extract_strided_slice %363 {offsets = [0, 32], sizes = [8, 32], strides = [1, 1]} : vector<8x128xf32> to vector<8x32xf32>
    %366 = vector.extract_strided_slice %363 {offsets = [0, 64], sizes = [8, 32], strides = [1, 1]} : vector<8x128xf32> to vector<8x32xf32>
    %367 = vector.extract_strided_slice %363 {offsets = [0, 96], sizes = [8, 32], strides = [1, 1]} : vector<8x128xf32> to vector<8x32xf32>
    %368 = arith.mulf %365, %320 : vector<8x32xf32>
    %369 = arith.mulf %364, %366 : vector<8x32xf32>
    %370 = arith.addf %368, %369 : vector<8x32xf32>
    %371 = math.tanh %370 : vector<8x32xf32>
    %372 = arith.mulf %367, %371 : vector<8x32xf32>
    %373 = arith.select %351, %372, %319 : vector<8x32xi1>, vector<8x32xf32>
    %374 = arith.select %351, %370, %320 : vector<8x32xi1>, vector<8x32xf32>
    %cst_55 = arith.constant 0.000000e+00 : f32
    %375 = vector.broadcast %cst_55 : f32 to vector<8x32xf32>
    %376 = arith.select %351, %373, %375 : vector<8x32xi1>, vector<8x32xf32>
    %377 = tpu.concatenate %376, %344 in 1 : vector<8x32xf32>, vector<8x32xf32> -> vector<8x64xf32>
    %378 = arith.truncf %377 : vector<8x64xf32> to vector<8x64xbf16>
    %cst_56 = arith.constant dense<0.000000e+00> : vector<8x128xf32>
    %379 = tpu.matmul %378, %2, %cst_56 {dimension_numbers = #tpu.dot_dimension_numbers<[1], [0], [0], [1], [0, 0, 1, 1], [], []>} : vector<8x64xbf16>, vector<64x128xbf16>, vector<8x128xf32> -> vector<8x128xf32>
    %380 = vector.broadcast %4 : vector<1x128xf32> to vector<8x128xf32>
    %381 = arith.addf %379, %380 : vector<8x128xf32>
    %382 = math.tanh %381 : vector<8x128xf32>
    %383 = arith.negf %381 : vector<8x128xf32>
    %384 = math.exp %383 : vector<8x128xf32>
    %cst_57 = arith.constant 1.000000e+00 : f32
    %385 = vector.broadcast %cst_57 : f32 to vector<8x128xf32>
    %386 = arith.addf %385, %384 : vector<8x128xf32>
    %387 = arith.divf %385, %386 : vector<8x128xf32>
    %388 = arith.select %13, %382, %387 : vector<8x128xi1>, vector<8x128xf32>
    %389 = vector.extract_strided_slice %388 {offsets = [0, 0], sizes = [8, 32], strides = [1, 1]} : vector<8x128xf32> to vector<8x32xf32>
    %390 = vector.extract_strided_slice %388 {offsets = [0, 32], sizes = [8, 32], strides = [1, 1]} : vector<8x128xf32> to vector<8x32xf32>
    %391 = vector.extract_strided_slice %388 {offsets = [0, 64], sizes = [8, 32], strides = [1, 1]} : vector<8x128xf32> to vector<8x32xf32>
    %392 = vector.extract_strided_slice %388 {offsets = [0, 96], sizes = [8, 32], strides = [1, 1]} : vector<8x128xf32> to vector<8x32xf32>
    %393 = arith.mulf %390, %345 : vector<8x32xf32>
    %394 = arith.mulf %389, %391 : vector<8x32xf32>
    %395 = arith.addf %393, %394 : vector<8x32xf32>
    %396 = math.tanh %395 : vector<8x32xf32>
    %397 = arith.mulf %392, %396 : vector<8x32xf32>
    %398 = arith.select %351, %397, %344 : vector<8x32xi1>, vector<8x32xf32>
    %399 = arith.select %351, %395, %345 : vector<8x32xi1>, vector<8x32xf32>
    %cst_58 = arith.constant 0.000000e+00 : f32
    %400 = vector.broadcast %cst_58 : f32 to vector<8x32xf32>
    %401 = arith.select %351, %398, %400 : vector<8x32xi1>, vector<8x32xf32>
    %402 = arith.maximumf %348, %401 : vector<8x32xf32>
    %403 = arith.addf %349, %401 : vector<8x32xf32>
    %c7_i32 = arith.constant 7 : i32
    %404 = vector.broadcast %c7_i32 : i32 to vector<8x32xi32>
    %405 = arith.cmpi sgt, %7, %404 : vector<8x32xi32>
    %406 = vector.extract_strided_slice %19 {offsets = [7, 0, 0], sizes = [1, 8, 128], strides = [1, 1, 1]} : vector<8x8x128xf32> to vector<1x8x128xf32>
    %407 = vector.shape_cast %406 : vector<1x8x128xf32> to vector<8x128xf32>
    %408 = arith.truncf %373 : vector<8x32xf32> to vector<8x32xbf16>
    %cst_59 = arith.constant dense<0.000000e+00> : vector<8x128xf32>
    %409 = tpu.matmul %408, %1, %cst_59 {dimension_numbers = #tpu.dot_dimension_numbers<[1], [0], [0], [1], [0, 0, 1, 1], [], []>} : vector<8x32xbf16>, vector<32x128xbf16>, vector<8x128xf32> -> vector<8x128xf32>
    %410 = arith.addf %407, %409 : vector<8x128xf32>
    %411 = math.tanh %410 : vector<8x128xf32>
    %412 = arith.negf %410 : vector<8x128xf32>
    %413 = math.exp %412 : vector<8x128xf32>
    %cst_60 = arith.constant 1.000000e+00 : f32
    %414 = vector.broadcast %cst_60 : f32 to vector<8x128xf32>
    %415 = arith.addf %414, %413 : vector<8x128xf32>
    %416 = arith.divf %414, %415 : vector<8x128xf32>
    %417 = arith.select %13, %411, %416 : vector<8x128xi1>, vector<8x128xf32>
    %418 = vector.extract_strided_slice %417 {offsets = [0, 0], sizes = [8, 32], strides = [1, 1]} : vector<8x128xf32> to vector<8x32xf32>
    %419 = vector.extract_strided_slice %417 {offsets = [0, 32], sizes = [8, 32], strides = [1, 1]} : vector<8x128xf32> to vector<8x32xf32>
    %420 = vector.extract_strided_slice %417 {offsets = [0, 64], sizes = [8, 32], strides = [1, 1]} : vector<8x128xf32> to vector<8x32xf32>
    %421 = vector.extract_strided_slice %417 {offsets = [0, 96], sizes = [8, 32], strides = [1, 1]} : vector<8x128xf32> to vector<8x32xf32>
    %422 = arith.mulf %419, %374 : vector<8x32xf32>
    %423 = arith.mulf %418, %420 : vector<8x32xf32>
    %424 = arith.addf %422, %423 : vector<8x32xf32>
    %425 = math.tanh %424 : vector<8x32xf32>
    %426 = arith.mulf %421, %425 : vector<8x32xf32>
    %427 = arith.select %405, %426, %373 : vector<8x32xi1>, vector<8x32xf32>
    %cst_61 = arith.constant 0.000000e+00 : f32
    %428 = vector.broadcast %cst_61 : f32 to vector<8x32xf32>
    %429 = arith.select %405, %427, %428 : vector<8x32xi1>, vector<8x32xf32>
    %430 = tpu.concatenate %429, %398 in 1 : vector<8x32xf32>, vector<8x32xf32> -> vector<8x64xf32>
    %431 = arith.truncf %430 : vector<8x64xf32> to vector<8x64xbf16>
    %cst_62 = arith.constant dense<0.000000e+00> : vector<8x128xf32>
    %432 = tpu.matmul %431, %2, %cst_62 {dimension_numbers = #tpu.dot_dimension_numbers<[1], [0], [0], [1], [0, 0, 1, 1], [], []>} : vector<8x64xbf16>, vector<64x128xbf16>, vector<8x128xf32> -> vector<8x128xf32>
    %433 = vector.broadcast %4 : vector<1x128xf32> to vector<8x128xf32>
    %434 = arith.addf %432, %433 : vector<8x128xf32>
    %435 = math.tanh %434 : vector<8x128xf32>
    %436 = arith.negf %434 : vector<8x128xf32>
    %437 = math.exp %436 : vector<8x128xf32>
    %cst_63 = arith.constant 1.000000e+00 : f32
    %438 = vector.broadcast %cst_63 : f32 to vector<8x128xf32>
    %439 = arith.addf %438, %437 : vector<8x128xf32>
    %440 = arith.divf %438, %439 : vector<8x128xf32>
    %441 = arith.select %13, %435, %440 : vector<8x128xi1>, vector<8x128xf32>
    %442 = vector.extract_strided_slice %441 {offsets = [0, 0], sizes = [8, 32], strides = [1, 1]} : vector<8x128xf32> to vector<8x32xf32>
    %443 = vector.extract_strided_slice %441 {offsets = [0, 32], sizes = [8, 32], strides = [1, 1]} : vector<8x128xf32> to vector<8x32xf32>
    %444 = vector.extract_strided_slice %441 {offsets = [0, 64], sizes = [8, 32], strides = [1, 1]} : vector<8x128xf32> to vector<8x32xf32>
    %445 = vector.extract_strided_slice %441 {offsets = [0, 96], sizes = [8, 32], strides = [1, 1]} : vector<8x128xf32> to vector<8x32xf32>
    %446 = arith.mulf %443, %399 : vector<8x32xf32>
    %447 = arith.mulf %442, %444 : vector<8x32xf32>
    %448 = arith.addf %446, %447 : vector<8x32xf32>
    %449 = math.tanh %448 : vector<8x32xf32>
    %450 = arith.mulf %445, %449 : vector<8x32xf32>
    %451 = arith.select %405, %450, %398 : vector<8x32xi1>, vector<8x32xf32>
    %cst_64 = arith.constant 0.000000e+00 : f32
    %452 = vector.broadcast %cst_64 : f32 to vector<8x32xf32>
    %453 = arith.select %405, %451, %452 : vector<8x32xi1>, vector<8x32xf32>
    %454 = arith.maximumf %402, %453 : vector<8x32xf32>
    %455 = arith.addf %403, %453 : vector<8x32xf32>
    %cst_65 = arith.constant 1.250000e-01 : f32
    %456 = vector.broadcast %cst_65 : f32 to vector<8x32xf32>
    %457 = arith.mulf %455, %456 : vector<8x32xf32>
    %c7_i32_66 = arith.constant 7 : i32
    %458 = vector.broadcast %c7_i32_66 : i32 to vector<8x32xi32>
    %459 = arith.cmpi sgt, %7, %458 : vector<8x32xi32>
    %cst_67 = arith.constant 0.000000e+00 : f32
    %460 = vector.broadcast %cst_67 : f32 to vector<8x32xf32>
    %461 = arith.select %459, %451, %460 : vector<8x32xi1>, vector<8x32xf32>
    %462 = arith.truncf %454 : vector<8x32xf32> to vector<8x32xbf16>
    %c0_68 = arith.constant 0 : index
    %c0_69 = arith.constant 0 : index
    %463 = vector.load %arg5[%c0_68, %c0_69] : memref<96x32xbf16, #tpu.memory_space<vmem>>, vector<32x32xbf16>
    %cst_70 = arith.constant dense<0.000000e+00> : vector<8x32xf32>
    %464 = tpu.matmul %462, %463, %cst_70 {dimension_numbers = #tpu.dot_dimension_numbers<[1], [0], [0], [1], [0, 0, 1, 1], [], []>} : vector<8x32xbf16>, vector<32x32xbf16>, vector<8x32xf32> -> vector<8x32xf32>
    %465 = arith.truncf %457 : vector<8x32xf32> to vector<8x32xbf16>
    %c32 = arith.constant 32 : index
    %c0_71 = arith.constant 0 : index
    %466 = vector.load %arg5[%c32, %c0_71] : memref<96x32xbf16, #tpu.memory_space<vmem>>, vector<32x32xbf16>
    %cst_72 = arith.constant dense<0.000000e+00> : vector<8x32xf32>
    %467 = tpu.matmul %465, %466, %cst_72 {dimension_numbers = #tpu.dot_dimension_numbers<[1], [0], [0], [1], [0, 0, 1, 1], [], []>} : vector<8x32xbf16>, vector<32x32xbf16>, vector<8x32xf32> -> vector<8x32xf32>
    %468 = arith.addf %464, %467 : vector<8x32xf32>
    %469 = arith.truncf %461 : vector<8x32xf32> to vector<8x32xbf16>
    %c64 = arith.constant 64 : index
    %c0_73 = arith.constant 0 : index
    %470 = vector.load %arg5[%c64, %c0_73] : memref<96x32xbf16, #tpu.memory_space<vmem>>, vector<32x32xbf16>
    %cst_74 = arith.constant dense<0.000000e+00> : vector<8x32xf32>
    %471 = tpu.matmul %469, %470, %cst_74 {dimension_numbers = #tpu.dot_dimension_numbers<[1], [0], [0], [1], [0, 0, 1, 1], [], []>} : vector<8x32xbf16>, vector<32x32xbf16>, vector<8x32xf32> -> vector<8x32xf32>
    %472 = arith.addf %468, %471 : vector<8x32xf32>
    %c0_75 = arith.constant 0 : index
    %c0_76 = arith.constant 0 : index
    %473 = vector.load %arg6[%c0_75, %c0_76] : memref<1x32xf32, #tpu.memory_space<vmem>>, vector<1x32xf32>
    %474 = vector.broadcast %473 : vector<1x32xf32> to vector<8x32xf32>
    %475 = arith.addf %472, %474 : vector<8x32xf32>
    %cst_77 = arith.constant 0.000000e+00 : f32
    %476 = vector.broadcast %cst_77 : f32 to vector<8x32xf32>
    %477 = arith.maximumf %475, %476 : vector<8x32xf32>
    %478 = arith.truncf %477 : vector<8x32xf32> to vector<8x32xbf16>
    %c0_78 = arith.constant 0 : index
    %c0_79 = arith.constant 0 : index
    %479 = vector.load %arg7[%c0_78, %c0_79] : memref<32x128xbf16, #tpu.memory_space<vmem>>, vector<32x128xbf16>
    %cst_80 = arith.constant dense<0.000000e+00> : vector<8x128xf32>
    %480 = tpu.matmul %478, %479, %cst_80 {dimension_numbers = #tpu.dot_dimension_numbers<[1], [0], [0], [1], [0, 0, 1, 1], [], []>} : vector<8x32xbf16>, vector<32x128xbf16>, vector<8x128xf32> -> vector<8x128xf32>
    %c0_81 = arith.constant 0 : index
    %c0_82 = arith.constant 0 : index
    %481 = vector.load %arg8[%c0_81, %c0_82] : memref<1x128xf32, #tpu.memory_space<vmem>>, vector<1x128xf32>
    %482 = vector.broadcast %481 : vector<1x128xf32> to vector<8x128xf32>
    %483 = arith.addf %480, %482 : vector<8x128xf32>
    %c0_83 = arith.constant 0 : index
    %c0_84 = arith.constant 0 : index
    %484 = vector.load %arg9[%c0_83, %c0_84] : memref<8x128xf32, #tpu.memory_space<vmem>>, vector<8x128xf32>
    tpu.vector_store %arg9[%c0_83, %c0_84], %483 {strides = array<i32>} : memref<8x128xf32, #tpu.memory_space<vmem>>, vector<8x128xf32>,
    return
  }
  func.func @transform_0(%arg0: i32) -> (i32, i32, i32) {
    %c0_i32 = arith.constant 0 : i32
    %c0_i32_0 = arith.constant 0 : i32
    %c0_i32_1 = arith.constant 0 : i32
    return %c0_i32, %arg0, %c0_i32_0 : i32, i32, i32
  }
  func.func @transform_1(%arg0: i32) -> (i32, i32) {
    %c0_i32 = arith.constant 0 : i32
    %c0_i32_0 = arith.constant 0 : i32
    return %arg0, %c0_i32 : i32, i32
  }
  func.func @transform_2(%arg0: i32) -> (i32, i32) {
    %c0_i32 = arith.constant 0 : i32
    %c0_i32_0 = arith.constant 0 : i32
    %c0_i32_1 = arith.constant 0 : i32
    return %c0_i32, %c0_i32_0 : i32, i32
  }
  func.func @transform_3(%arg0: i32) -> (i32, i32) {
    %c0_i32 = arith.constant 0 : i32
    %c0_i32_0 = arith.constant 0 : i32
    %c0_i32_1 = arith.constant 0 : i32
    return %c0_i32, %c0_i32_0 : i32, i32
  }
  func.func @transform_4(%arg0: i32) -> (i32, i32) {
    %c0_i32 = arith.constant 0 : i32
    %c0_i32_0 = arith.constant 0 : i32
    %c0_i32_1 = arith.constant 0 : i32
    return %c0_i32, %c0_i32_0 : i32, i32
  }
  func.func @transform_5(%arg0: i32) -> (i32, i32) {
    %c0_i32 = arith.constant 0 : i32
    %c0_i32_0 = arith.constant 0 : i32
    %c0_i32_1 = arith.constant 0 : i32
    return %c0_i32, %c0_i32_0 : i32, i32
  }
  func.func @transform_6(%arg0: i32) -> (i32, i32) {
    %c0_i32 = arith.constant 0 : i32
    %c0_i32_0 = arith.constant 0 : i32
    %c0_i32_1 = arith.constant 0 : i32
    return %c0_i32, %c0_i32_0 : i32, i32
  }
  func.func @transform_7(%arg0: i32) -> (i32, i32) {
    %c0_i32 = arith.constant 0 : i32
    %c0_i32_0 = arith.constant 0 : i32
    %c0_i32_1 = arith.constant 0 : i32
    return %c0_i32, %c0_i32_0 : i32, i32
  }
  func.func @transform_8(%arg0: i32) -> (i32, i32) {
    %c0_i32 = arith.constant 0 : i32
    %c0_i32_0 = arith.constant 0 : i32
    return %arg0, %c0_i32 : i32, i32
  }
}

</mosaic_0001>

<bundles_post_ra>
// kernel: lstm_ecg_forward.1
= control target key start
LH: loop header
LB: loop body
LE: loop exit
PB: predicated region body
PF: predicated region fallthrough
CT: control target
= control target key end

     0   :  { %v2257_v0 = vmov 0.0   ;;  %vm2258_vm0 = vmmov 0   ;;  %vm93_vm1 = vcmask 130048   ;;  %v2259_v3 = vmov 0   ;;  %s2261_s19 = smov 32   ;;  %s3024_s2 = inlined_call_operand.vmem [shape: bf16[112,128], index: 2, kind: input, shape index: {}]   ;;  %s3025_s0 = inlined_call_operand.vmem [shape: bf16[8,8,16], index: 0, kind: input, shape index: {}]   ;;  %s3026_s1 = inlined_call_operand.vmem [shape: s32[8,1], index: 1, kind: input, shape index: {}]   ;;  %s3027_s3 = inlined_call_operand.vmem [shape: f32[2,128], index: 3, kind: input, shape index: {}]   ;;  %s3028_s4 = inlined_call_operand.vmem [shape: bf16[96,32], index: 4, kind: input, shape index: {}]   ;;  %s3029_s6 = inlined_call_operand.vmem [shape: bf16[32,128], index: 6, kind: input, shape index: {}]   ;;  %s3030_s5 = inlined_call_operand.vmem [shape: f32[1,32], index: 5, kind: input, shape index: {}]   ;;  %s3031_s7 = inlined_call_operand.vmem [shape: f32[1,128], index: 7, kind: input, shape index: {}]   ;;  %s3032_s8 = inlined_call_operand.vmem [shape: f32[8,128], index: 8, kind: output, shape index: {}]  }
   0x1   :  { %1903 = vmatprep.subr.bf16.mxu1 %v2257_v0  ;;  %v2102_v1 = vld [vmem:[%s3024_s2] sm:$0xff]   ;;  %1907 = vmatprep.mubr.msk.bf16.mxu1 %vm2258_vm0, %v2257_v0  ;;  %v2316_v2 = vld [vmem:[%s3024_s2 + $0x8] sm:$0xff]   ;;  %v2330_v6 = vld [vmem:[%s3024_s2 + $0x10] sm:$0xff]   ;;  %v50_v21 = vlaneseq  ;;  %vm184_vm6 = vcmask 261120   ;;  %vm290_vm7 = vcmask 523264  }
   0x2   :  { %2100 = vset.pattern.permute.xlu1 %v2259_v3  ;;  %2101 = vset.pattern.permute.xlu0 %v2259_v3  ;;  %v2104_v4 = vld [vmem:[%s3025_s0] sm:$0xff]   ;;  %v2105_v5 = vld [vmem:[%s3025_s0 + $0x8] sm:$0xff]   ;;  %v2371_v33 = vld [vmem:[%s3024_s2 + $0x18] sm:$0xff]  }
   0x3   :  { %1893 = vmatprep.subr.bf16.mxu0 %v2102_v1  ;;  %1904 = vmatpush3.bf16.msra.mxu1 %v2316_v2  ;;  %v46_v7 = vld [vmem:[%s3026_s1] sm:$0xff]  ;;  %v51_v23 = vand.u32 127, %v50_v21  ;;  %s2260_s1 = smov 64   ;;  %v2109_v34 = vld [vmem:[%s3025_s0 + $0x10] sm:$0xff]   ;;  %v2110_v35 = vld [vmem:[%s3025_s0 + $0x18] sm:$0xff]  }
   0x4   :  { %1894 = vmatpush3.bf16.msra.mxu0 %v2102_v1  ;;  %1895 = vmatprep.mubr.msk.bf16.mxu0 %vm93_vm1, %v2104_v4  ;;  %v2348_v8 = vld [vmem:[%s3027_s3] ss:$0 sm:$0xff]  ;;  %v2394_v37 = vld [vmem:[%s3024_s2 + $0x28] sm:$0xff]   ;;  %v2403_v39 = vld [vmem:[%s3024_s2 + $0x30] sm:$0xff]  }
   0x5   :  { %1905 = vmatprep.subr.bf16.mxu1 %v2257_v0  ;;  %1911 = vmatprep.subr.bf16.mxu0 %v2257_v0  ;;  %vm52_vm2 = vcmp.ge.s32.totalorder %v51_v23, 64  ;;  %vm53_vm3 = vcmp.lt.s32.totalorder %v51_v23, 96  ;;  %v2383_v36 = vld [vmem:[%s3024_s2 + $0x20] sm:$0xff]   ;;  %v2113_v24 = vld [vmem:[%s3028_s4 + $0x10] sm:$0xff]  }
   0x6   :  { %48 = vperm.xlu1 %2100, %v46_v7   ;;  %vm2357_vm4 = vmand %vm52_vm2, %vm53_vm3  ;;  %v2451_v54 = vld [vmem:[%s3027_s3 + $0x1] ss:$0 sm:$0xff] }
   0x7   :  { %1896 = vmatmul.mubr.msk.bf16.vlgmr.msra.gmra.mrb[0].mxu0 %vm93_vm1, %v2105_v5  ;;  %1906 = vmatpush3.bf16.msra.mxu1 %v2330_v6 }
   0x8   :  { %1923 = vmatprep.subr.bf16.mxu1 %v2257_v0  ;;  %1912 = vmatpush3.bf16.msra.mxu0 %v2371_v33 }
   0x9   :  { %1899 = vmatprep.mubr.msk.bf16.mxu0 %vm93_vm1, %v2109_v34  ;;  %1913 = vmatprep.subr.bf16.mxu0 %v2257_v0 }
   0xa   :  { %1908 = vmatmul.mubr.bf16.vlgmr.msra.gmra.mrb[0].mxu1 %v2259_v3 }
   0xb   :  { %1924 = vmatpush3.bf16.msra.mxu1 %v2316_v2  ;;  %1927 = vmatprep.mubr.msk.bf16.mxu1 %vm2258_vm0, %v2257_v0 }
   0xc   :  { %1925 = vmatprep.subr.bf16.mxu1 %v2257_v0  ;;  %1914 = vmatpush3.bf16.msra.mxu0 %v2383_v36 }
   0xd   :  { %1915 = vmatprep.subr.bf16.mxu0 %v2257_v0 }
   0xf   :  { %1926 = vmatpush3.bf16.msra.mxu1 %v2330_v6  ;;  %1900 = vmatmul.mubr.msk.bf16.gmra.mrb[4].mxu0 %vm93_vm1, %v2110_v35 }
  0x10   :  { %1931 = vmatprep.subr.bf16.mxu1 %v2257_v0  ;;  %1919 = vmatprep.mubr.msk.bf16.mxu0 %vm2258_vm0, %v2257_v0 }
  0x11   :  { %1916 = vmatpush3.bf16.msra.mxu0 %v2394_v37 }
  0x12   :  { %1917 = vmatprep.subr.bf16.mxu0 %v2257_v0 }
  0x15   :  { %1918 = vmatpush3.bf16.msra.mxu0 %v2403_v39 }
  0x16   :  { %1943 = vmatprep.subr.bf16.mxu0 %v2257_v0 }
  0x85   :  { %v2407_v40 = vpop.permute.xlu1 %48 }
  0x86   :  { %vm171_vm5 = vcmp.gt.s32.totalorder %v2407_v40, 0  ;;  %vm362_vm8 = vcmp.gt.s32.totalorder %v2407_v40, 1  ;;  %vm522_vm9 = vcmp.gt.s32.totalorder %v2407_v40, 2  ;;  %vm682_vm10 = vcmp.gt.s32.totalorder %v2407_v40, 3 }
  0x87   :  { %vm842_vm11 = vcmp.gt.s32.totalorder %v2407_v40, 4  ;;  %vm1002_vm12 = vcmp.gt.s32.totalorder %v2407_v40, 5  ;;  %vm1162_vm13 = vcmp.gt.s32.totalorder %v2407_v40, 6  ;;  %vm1322_vm14 = vcmp.gt.s32.totalorder %v2407_v40, 7  ;;  %v2118_v40 = vld [vmem:[%s3028_s4 + $0x8] sm:$0xff]  }
  0xda   :  { %v2350_v9 = vpop.f32.mrb[0].mxu0 }
  0xdb   :  { %v140_v10 = vpop.f32.mrb[1].mxu0 }
  0xdc   :  { %v141_v11 = vadd.f32 %v2348_v8, %v140_v10  ;;  %v2353_v12 = vpop.f32.mrb[2].mxu0 }
  0xdd   :  { %v2355_v13 = vpop.f32.mrb[3].mxu0  ;;  %v222_v14 = vpop.f32.mrb[0].mxu1 }
  0xde   :  { %v228_v15 = vadd.f32 %v222_v14, %v141_v11  ;;  %v1909_v16 = vpop.f32.mrb[1].mxu1  ;;  %v144_v53 = vadd.f32 %v2348_v8, %v2355_v13 }
  0xdf   :  { %v225_v17 = vpop.f32.mrb[2].mxu1 }
  0xe0   :  { %v1762_v18 = vmul.f32 -1.442695, %v228_v15  ;;  %v1910_v19 = vpop.f32.mrb[3].mxu1 }
  0xe2   :  { %2121 = vpow2.f32 %v1762_v18  ;;  %v2419_v45 = vpop.f32.mrb[4].mxu0 }
  0xe3   :  { %2123 = vtanh.f32 %v228_v15  ;;  %v2421_v46 = vpop.f32.mrb[5].mxu0 }
  0xe4   :  { %v2423_v47 = vpop.f32.mrb[6].mxu0 }
  0xe5   :  { %v2425_v48 = vpop.f32.mrb[7].mxu0 }
  0xec   :  { %v2122_v20 = vpop.eup %2121 }
  0xed   :  { %v233_v22 = vadd.f32 1.0, %v2122_v20  ;;  %v2124_v25 = vpop.eup %2123 }
  0xef   :  { %2125 = vrcp.f32 %v233_v22 }
  0xf9   :  { %v2126_v26 = vpop.eup %2125 }
  0xfa   :  { %v236_v27 = vsel %vm2357_vm4, %v2124_v25, %v2126_v26 }
  0xfb   :  { %239 = vrot.lane.b32.xlu0 %v236_v27, %s2260_s1  ;;  %v237_v30 = vmul.f32 0.0, %v236_v27 }
 0x16d   :  { %v240_v28 = vpop.permute.xlu0 %239 }
 0x16e   :  { %v242_v29 = vmul.f32 %v240_v28, %v236_v27 }
 0x170   :  { %244 = vrot.lane.b32.xlu0 %v242_v29, %s2261_s19 }
 0x1e2   :  { %v245_v31 = vpop.permute.xlu0 %244 }
 0x1e3   :  { %v2365_v32 = vadd.f32 %v245_v31, %v237_v30 }
 0x1e5   :  { %2127 = vtanh.f32 %v2365_v32  ;;  %v2465_v23 = vsel %vm171_vm5, %v2365_v32, 0.0 }
 0x1ef   :  { %v2128_v38 = vpop.eup %2127 }
 0x1f0   :  { %250 = vrot.lane.b32.xlu1 %v2128_v38, %s2260_s1 }
 0x262   :  { %v251_v41 = vpop.permute.xlu1 %250 }
 0x263   :  { %v253_v42 = vmul.f32 %v251_v41, %v236_v27 }
 0x265   :  { %v2412_v43 = vsel %vm171_vm5, %v253_v42, 0.0 }
 0x266   :  { %257 = vrot.lane.b32.xlu0 %v2412_v43, %s2261_s19  ;;  %v363_v44 = vpack.c.bf16 %v2412_v43, %v2412_v43 }
 0x268   :  { %365 = vrot.lane.b32.xlu1 %v363_v44, %s2261_s19 }
 0x2d8   :  { %v258_v49 = vpop.permute.xlu0 %257 }
 0x2d9   :  { %v260_v50 = vsel %vm184_vm6, %v258_v49, 0.0 }
 0x2da   :  { %v261_v51 = vpack.c.bf16 %v260_v50, %v260_v50  ;;  %v366_v52 = vpop.permute.xlu1 %365 }
 0x2db   :  { %1928 = vmatmul.mubr.msk.bf16.vlgmr.msra.gmra.mrb[4].mxu1 %vm184_vm6, %v366_v52 }
 0x2dc   :  { %1920 = vmatmul.mubr.msk.bf16.vlgmr.msra.gmra.mrb[8].mxu0 %vm290_vm7, %v261_v51  ;;  %1932 = vmatpush3.bf16.msra.mxu1 %v2371_v33 }
 0x2dd   :  { %1933 = vmatprep.subr.bf16.mxu1 %v2257_v0  ;;  %1944 = vmatpush3.bf16.msra.mxu0 %v2316_v2 }
 0x2de   :  { %1945 = vmatprep.subr.bf16.mxu0 %v2257_v0  ;;  %1939 = vmatprep.mubr.msk.bf16.mxu1 %vm2258_vm0, %v2257_v0 }
 0x2df   :  { %1947 = vmatprep.mubr.msk.bf16.mxu0 %vm2258_vm0, %v2257_v0 }
 0x2e0   :  { %1934 = vmatpush3.bf16.msra.mxu1 %v2383_v36 }
 0x2e1   :  { %1935 = vmatprep.subr.bf16.mxu1 %v2257_v0  ;;  %1946 = vmatpush3.bf16.msra.mxu0 %v2330_v6 }
 0x2e2   :  { %1951 = vmatprep.subr.bf16.mxu0 %v2257_v0 }
 0x2e4   :  { %1936 = vmatpush3.bf16.msra.mxu1 %v2394_v37 }
 0x2e5   :  { %1937 = vmatprep.subr.bf16.mxu1 %v2257_v0 }
 0x2e8   :  { %1938 = vmatpush3.bf16.msra.mxu1 %v2403_v39 }
 0x2e9   :  { %1963 = vmatprep.subr.bf16.mxu1 %v2257_v0 }
 0x3ae   :  { %v404_v55 = vpop.f32.mrb[4].mxu1 }
 0x3af   :  { %v410_v56 = vadd.f32 %v404_v55, %v144_v53  ;;  %v328_v57 = vpop.f32.mrb[8].mxu0  ;;  %v1929_v58 = vpop.f32.mrb[5].mxu1 }
 0x3b0   :  { %v329_v59 = vadd.f32 %v2451_v54, %v328_v57  ;;  %v1921_v60 = vpop.f32.mrb[9].mxu0  ;;  %v407_v61 = vpop.f32.mrb[6].mxu1 }
 0x3b1   :  { %v1771_v62 = vmul.f32 -1.442695, %v410_v56  ;;  %v331_v63 = vpop.f32.mrb[10].mxu0  ;;  %v1930_v1 = vpop.f32.mrb[7].mxu1 }
 0x3b2   :  { %v1769_v3 = vmul.f32 -1.442695, %v329_v59  ;;  %v1922_v4 = vpop.f32.mrb[11].mxu0 }
 0x3b3   :  { %2129 = vpow2.f32 %v1771_v62 }
 0x3b4   :  { %2131 = vpow2.f32 %v1769_v3 }
 0x3b5   :  { %2133 = vtanh.f32 %v410_v56  ;;  %v149_v56 = vadd.f32 %v2350_v9, %v2348_v8 }
 0x3b6   :  { %2135 = vtanh.f32 %v329_v59 }
 0x3bd   :  { %v2130_v5 = vpop.eup %2129 }
 0x3be   :  { %v2132_v7 = vpop.eup %2131  ;;  %v415_v10 = vadd.f32 1.0, %v2130_v5 }
 0x3bf   :  { %v338_v11 = vadd.f32 1.0, %v2132_v7  ;;  %v2134_v13 = vpop.eup %2133 }
 0x3c0   :  { %2137 = vrcp.f32 %v415_v10  ;;  %v2136_v14 = vpop.eup %2135 }
 0x3c1   :  { %2139 = vrcp.f32 %v338_v11 }
 0x3ca   :  { %v2138_v15 = vpop.eup %2137 }
 0x3cb   :  { %v2140_v16 = vpop.eup %2139  ;;  %v418_v17 = vsel %vm2357_vm4, %v2134_v13, %v2138_v15 }
 0x3cc   :  { %421 = vrot.lane.b32.xlu1 %v418_v17, %s2260_s1  ;;  %v341_v18 = vsel %vm2357_vm4, %v2136_v14, %v2140_v16  ;;  %v419_v25 = vmul.f32 %v418_v17, %v2465_v23 }
 0x3cd   :  { %344 = vrot.lane.b32.xlu0 %v341_v18, %s2260_s1  ;;  %v342_v27 = vmul.f32 0.0, %v341_v18 }
 0x43e   :  { %v422_v19 = vpop.permute.xlu1 %421 }
 0x43f   :  { %v424_v20 = vmul.f32 %v422_v19, %v418_v17  ;;  %v345_v21 = vpop.permute.xlu0 %344 }
 0x440   :  { %v347_v22 = vmul.f32 %v345_v21, %v341_v18 }
 0x441   :  { %426 = vrot.lane.b32.xlu1 %v424_v20, %s2261_s19 }
 0x442   :  { %349 = vrot.lane.b32.xlu0 %v347_v22, %s2261_s19 }
 0x4b3   :  { %v427_v26 = vpop.permute.xlu1 %426 }
 0x4b4   :  { %v2468_v28 = vadd.f32 %v427_v26, %v419_v25  ;;  %v350_v29 = vpop.permute.xlu0 %349 }
 0x4b5   :  { %v2470_v30 = vadd.f32 %v350_v29, %v342_v27 }
 0x4b6   :  { %2141 = vtanh.f32 %v2468_v28  ;;  %v2533_v27 = vsel %vm362_vm8, %v2468_v28, %v2465_v23 }
 0x4b7   :  { %2143 = vtanh.f32 %v2470_v30  ;;  %v2527_v26 = vsel %vm171_vm5, %v2470_v30, 0.0 }
 0x4c0   :  { %v2142_v31 = vpop.eup %2141 }
 0x4c1   :  { %v2144_v34 = vpop.eup %2143  ;;  %432 = vrot.lane.b32.xlu1 %v2142_v31, %s2260_s1 }
 0x4c2   :  { %355 = vrot.lane.b32.xlu0 %v2144_v34, %s2260_s1 }
 0x533   :  { %v433_v32 = vpop.permute.xlu1 %432 }
 0x534   :  { %v435_v35 = vmul.f32 %v433_v32, %v418_v17  ;;  %v356_v38 = vpop.permute.xlu0 %355 }
 0x535   :  { %v358_v41 = vmul.f32 %v356_v38, %v341_v18 }
 0x536   :  { %v438_v42 = vsel %vm362_vm8, %v435_v35, 0.0  ;;  %v2482_v44 = vsel %vm362_vm8, %v435_v35, %v2412_v43 }
 0x537   :  { %v2486_v49 = vsel %vm171_vm5, %v358_v41, 0.0  ;;  %440 = vrot.lane.b32.xlu0 %v438_v42, %s2261_s19  ;;  %v523_v50 = vpack.c.bf16 %v2482_v44, %v2482_v44 }
 0x538   :  { %444 = vrot.lane.b32.xlu1 %v2486_v49, %s2260_s1 }
 0x53b   :  { %525 = vrot.lane.b32.xlu0 %v523_v50, %s2261_s19 }
 0x5a9   :  { %v441_v51 = vpop.permute.xlu0 %440 }
 0x5aa   :  { %v445_v52 = vpop.permute.xlu1 %444 }
 0x5ab   :  { %v447_v53 = vsel %vm184_vm6, %v441_v51, %v445_v52 }
 0x5ac   :  { %v448_v43 = vpack.c.bf16 %v447_v53, %v447_v53 }
 0x5ad   :  { %v526_v55 = vpop.permute.xlu0 %525 }
 0x5ae   :  { %1940 = vmatmul.mubr.msk.bf16.vlgmr.msra.gmra.mrb[8].mxu1 %vm290_vm7, %v448_v43  ;;  %1948 = vmatmul.mubr.msk.bf16.vlgmr.msra.gmra.mrb[12].mxu0 %vm184_vm6, %v526_v55 }
 0x5af   :  { %1952 = vmatpush3.bf16.msra.mxu0 %v2371_v33  ;;  %1964 = vmatpush3.bf16.msra.mxu1 %v2316_v2 }
 0x5b0   :  { %1953 = vmatprep.subr.bf16.mxu0 %v2257_v0  ;;  %1965 = vmatprep.subr.bf16.mxu1 %v2257_v0 }
 0x5b1   :  { %1959 = vmatprep.mubr.msk.bf16.mxu0 %vm2258_vm0, %v2257_v0  ;;  %1967 = vmatprep.mubr.msk.bf16.mxu1 %vm2258_vm0, %v2257_v0 }
 0x5b3   :  { %1954 = vmatpush3.bf16.msra.mxu0 %v2383_v36  ;;  %1966 = vmatpush3.bf16.msra.mxu1 %v2330_v6 }
 0x5b4   :  { %1955 = vmatprep.subr.bf16.mxu0 %v2257_v0  ;;  %1971 = vmatprep.subr.bf16.mxu1 %v2257_v0 }
 0x5b7   :  { %1956 = vmatpush3.bf16.msra.mxu0 %v2394_v37 }
 0x5b8   :  { %1957 = vmatprep.subr.bf16.mxu0 %v2257_v0 }
 0x5bb   :  { %1958 = vmatpush3.bf16.msra.mxu0 %v2403_v39 }
 0x5bc   :  { %1983 = vmatprep.subr.bf16.mxu0 %v2257_v0 }
 0x681   :  { %v486_v57 = vpop.f32.mrb[8].mxu1  ;;  %v564_v58 = vpop.f32.mrb[12].mxu0 }
 0x682   :  { %v487_v59 = vadd.f32 %v2451_v54, %v486_v57  ;;  %v570_v60 = vadd.f32 %v564_v58, %v149_v56  ;;  %v1941_v61 = vpop.f32.mrb[9].mxu1  ;;  %v1949_v62 = vpop.f32.mrb[13].mxu0 }
 0x683   :  { %v489_v63 = vpop.f32.mrb[10].mxu1  ;;  %v567_v1 = vpop.f32.mrb[14].mxu0 }
 0x684   :  { %v1773_v3 = vmul.f32 -1.442695, %v487_v59  ;;  %v1775_v4 = vmul.f32 -1.442695, %v570_v60  ;;  %v1942_v5 = vpop.f32.mrb[11].mxu1  ;;  %v1950_v7 = vpop.f32.mrb[15].mxu0 }
 0x686   :  { %2145 = vpow2.f32 %v1773_v3 }
 0x687   :  { %2147 = vpow2.f32 %v1775_v4 }
 0x688   :  { %2149 = vtanh.f32 %v487_v59 }
 0x689   :  { %2151 = vtanh.f32 %v570_v60 }
 0x690   :  { %v2146_v10 = vpop.eup %2145 }
 0x691   :  { %v2148_v11 = vpop.eup %2147  ;;  %v496_v13 = vadd.f32 1.0, %v2146_v10 }
 0x692   :  { %v575_v9 = vadd.f32 1.0, %v2148_v11  ;;  %v2150_v14 = vpop.eup %2149 }
 0x693   :  { %2153 = vrcp.f32 %v496_v13  ;;  %v2152_v15 = vpop.eup %2151 }
 0x694   :  { %2155 = vrcp.f32 %v575_v9 }
 0x69d   :  { %v2154_v16 = vpop.eup %2153 }
 0x69e   :  { %v2156_v17 = vpop.eup %2155  ;;  %v499_v18 = vsel %vm2357_vm4, %v2150_v14, %v2154_v16 }
 0x69f   :  { %v578_v19 = vsel %vm2357_vm4, %v2152_v15, %v2156_v17  ;;  %502 = vrot.lane.b32.xlu1 %v499_v18, %s2260_s1  ;;  %v500_v29 = vmul.f32 %v499_v18, %v2527_v26 }
 0x6a0   :  { %581 = vrot.lane.b32.xlu0 %v578_v19, %s2260_s1  ;;  %v579_v31 = vmul.f32 %v578_v19, %v2533_v27 }
 0x711   :  { %v503_v20 = vpop.permute.xlu1 %502 }
 0x712   :  { %v582_v21 = vpop.permute.xlu0 %581  ;;  %v505_v22 = vmul.f32 %v503_v20, %v499_v18 }
 0x713   :  { %v584_v25 = vmul.f32 %v582_v21, %v578_v19 }
 0x714   :  { %507 = vrot.lane.b32.xlu1 %v505_v22, %s2261_s19 }
 0x715   :  { %586 = vrot.lane.b32.xlu0 %v584_v25, %s2261_s19 }
 0x786   :  { %v508_v34 = vpop.permute.xlu1 %507 }
 0x787   :  { %v587_v32 = vpop.permute.xlu0 %586  ;;  %v2537_v35 = vadd.f32 %v508_v34, %v500_v29 }
 0x788   :  { %v2539_v38 = vadd.f32 %v587_v32, %v579_v31 }
 0x789   :  { %2157 = vtanh.f32 %v2537_v35  ;;  %v2601_v34 = vsel %vm362_vm8, %v2537_v35, %v2527_v26 }
 0x78a   :  { %2159 = vtanh.f32 %v2539_v38 }
 0x793   :  { %v2158_v30 = vpop.eup %2157 }
 0x794   :  { %v2160_v41 = vpop.eup %2159  ;;  %513 = vrot.lane.b32.xlu1 %v2158_v30, %s2260_s1  ;;  %v2608_v30 = vsel %vm522_vm9, %v2539_v38, %v2533_v27 }
 0x795   :  { %592 = vrot.lane.b32.xlu0 %v2160_v41, %s2260_s1 }
 0x806   :  { %v514_v23 = vpop.permute.xlu1 %513 }
 0x807   :  { %v593_v28 = vpop.permute.xlu0 %592  ;;  %v2545_v42 = vmul.f32 %v514_v23, %v499_v18 }
 0x808   :  { %v595_v50 = vmul.f32 %v593_v28, %v578_v19 }
 0x809   :  { %v2552_v51 = vsel %vm362_vm8, %v2545_v42, %v2486_v49  ;;  %v519_v27 = vsel %vm362_vm8, %v2545_v42, 0.0 }
 0x80a   :  { %v598_v52 = vsel %vm522_vm9, %v595_v50, 0.0  ;;  %604 = vrot.lane.b32.xlu0 %v2552_v51, %s2260_s1  ;;  %v2561_v53 = vsel %vm522_vm9, %v595_v50, %v2482_v44  ;;  %v152_v44 = vadd.f32 %v2353_v12, %v2348_v8 }
 0x80b   :  { %600 = vrot.lane.b32.xlu1 %v598_v52, %s2261_s19  ;;  %v683_v43 = vpack.c.bf16 %v2561_v53, %v2561_v53 }
 0x80f   :  { %685 = vrot.lane.b32.xlu1 %v683_v43, %s2261_s19 }
 0x87c   :  { %v605_v55 = vpop.permute.xlu0 %604 }
 0x87d   :  { %v601_v56 = vpop.permute.xlu1 %600 }
 0x87e   :  { %v607_v57 = vsel %vm184_vm6, %v601_v56, %v605_v55  ;;  %v520_v56 = vmax.f32 %v2486_v49, %v519_v27 }
 0x87f   :  { %v608_v58 = vpack.c.bf16 %v607_v57, %v607_v57  ;;  %v521_v57 = vadd.f32 %v519_v27, %v2486_v49 }
 0x881   :  { %1960 = vmatmul.mubr.msk.bf16.vlgmr.msra.gmra.mrb[16].mxu0 %vm290_vm7, %v608_v58  ;;  %v686_v59 = vpop.permute.xlu1 %685 }
 0x882   :  { %1968 = vmatmul.mubr.msk.bf16.vlgmr.msra.gmra.mrb[12].mxu1 %vm184_vm6, %v686_v59  ;;  %1984 = vmatpush3.bf16.msra.mxu0 %v2316_v2 }
 0x883   :  { %1972 = vmatpush3.bf16.msra.mxu1 %v2371_v33  ;;  %1985 = vmatprep.subr.bf16.mxu0 %v2257_v0 }
 0x884   :  { %1973 = vmatprep.subr.bf16.mxu1 %v2257_v0  ;;  %1979 = vmatprep.mubr.msk.bf16.mxu1 %vm2258_vm0, %v2257_v0 }
 0x885   :  { %1987 = vmatprep.mubr.msk.bf16.mxu0 %vm2258_vm0, %v2257_v0 }
 0x886   :  { %1986 = vmatpush3.bf16.msra.mxu0 %v2330_v6 }
 0x887   :  { %1974 = vmatpush3.bf16.msra.mxu1 %v2383_v36  ;;  %1991 = vmatprep.subr.bf16.mxu0 %v2257_v0 }
 0x888   :  { %1975 = vmatprep.subr.bf16.mxu1 %v2257_v0 }
 0x88b   :  { %1976 = vmatpush3.bf16.msra.mxu1 %v2394_v37 }
 0x88c   :  { %1977 = vmatprep.subr.bf16.mxu1 %v2257_v0 }
 0x88f   :  { %1978 = vmatpush3.bf16.msra.mxu1 %v2403_v39 }
 0x890   :  { %2003 = vmatprep.subr.bf16.mxu1 %v2257_v0 }
 0x954   :  { %v646_v60 = vpop.f32.mrb[16].mxu0 }
 0x955   :  { %v647_v61 = vadd.f32 %v2451_v54, %v646_v60  ;;  %v1961_v62 = vpop.f32.mrb[17].mxu0  ;;  %v724_v63 = vpop.f32.mrb[12].mxu1 }
 0x956   :  { %v730_v1 = vadd.f32 %v724_v63, %v152_v44  ;;  %v649_v3 = vpop.f32.mrb[18].mxu0  ;;  %v1969_v4 = vpop.f32.mrb[13].mxu1 }
 0x957   :  { %v1777_v5 = vmul.f32 -1.442695, %v647_v61  ;;  %v1962_v7 = vpop.f32.mrb[19].mxu0  ;;  %v727_v10 = vpop.f32.mrb[14].mxu1 }
 0x958   :  { %v1779_v11 = vmul.f32 -1.442695, %v730_v1  ;;  %v1970_v13 = vpop.f32.mrb[15].mxu1 }
 0x959   :  { %2161 = vpow2.f32 %v1777_v5 }
 0x95a   :  { %2163 = vpow2.f32 %v1779_v11 }
 0x95b   :  { %2165 = vtanh.f32 %v647_v61 }
 0x95c   :  { %2167 = vtanh.f32 %v730_v1 }
 0x963   :  { %v2162_v9 = vpop.eup %2161 }
 0x964   :  { %v2164_v14 = vpop.eup %2163  ;;  %v656_v15 = vadd.f32 1.0, %v2162_v9 }
 0x965   :  { %v735_v12 = vadd.f32 1.0, %v2164_v14  ;;  %v2166_v16 = vpop.eup %2165 }
 0x966   :  { %2169 = vrcp.f32 %v656_v15  ;;  %v2168_v17 = vpop.eup %2167 }
 0x967   :  { %2171 = vrcp.f32 %v735_v12 }
 0x970   :  { %v2170_v18 = vpop.eup %2169 }
 0x971   :  { %v2172_v19 = vpop.eup %2171  ;;  %v659_v20 = vsel %vm2357_vm4, %v2166_v16, %v2170_v18 }
 0x972   :  { %662 = vrot.lane.b32.xlu0 %v659_v20, %s2260_s1  ;;  %v738_v21 = vsel %vm2357_vm4, %v2168_v17, %v2172_v19  ;;  %v660_v32 = vmul.f32 %v659_v20, %v2601_v34 }
 0x973   :  { %741 = vrot.lane.b32.xlu1 %v738_v21, %s2260_s1  ;;  %v739_v23 = vmul.f32 %v738_v21, %v2608_v30 }
 0x9e4   :  { %v663_v22 = vpop.permute.xlu0 %662 }
 0x9e5   :  { %v665_v25 = vmul.f32 %v663_v22, %v659_v20  ;;  %v742_v29 = vpop.permute.xlu1 %741 }
 0x9e6   :  { %v744_v31 = vmul.f32 %v742_v29, %v738_v21 }
 0x9e7   :  { %667 = vrot.lane.b32.xlu0 %v665_v25, %s2261_s19 }
 0x9e8   :  { %746 = vrot.lane.b32.xlu1 %v744_v31, %s2261_s19 }
 0xa59   :  { %v668_v41 = vpop.permute.xlu0 %667 }
 0xa5a   :  { %v2611_v28 = vadd.f32 %v668_v41, %v660_v32  ;;  %v747_v50 = vpop.permute.xlu1 %746 }
 0xa5b   :  { %v2613_v52 = vadd.f32 %v747_v50, %v739_v23 }
 0xa5c   :  { %2173 = vtanh.f32 %v2611_v28  ;;  %v2683_v27 = vsel %vm522_vm9, %v2611_v28, %v2601_v34 }
 0xa5d   :  { %2175 = vtanh.f32 %v2613_v52 }
 0xa66   :  { %v2174_v26 = vpop.eup %2173 }
 0xa67   :  { %v2176_v35 = vpop.eup %2175  ;;  %673 = vrot.lane.b32.xlu0 %v2174_v26, %s2260_s1 }
 0xa68   :  { %752 = vrot.lane.b32.xlu1 %v2176_v35, %s2260_s1 }
 0xad9   :  { %v674_v38 = vpop.permute.xlu0 %673 }
 0xada   :  { %v676_v43 = vmul.f32 %v674_v38, %v659_v20  ;;  %v753_v55 = vpop.permute.xlu1 %752 }
 0xadb   :  { %v755_v58 = vmul.f32 %v753_v55, %v738_v21 }
 0xadc   :  { %v679_v59 = vsel %vm522_vm9, %v676_v43, 0.0  ;;  %v2629_v44 = vsel %vm522_vm9, %v676_v43, %v2552_v51  ;;  %v2690_v43 = vsel %vm682_vm10, %v2613_v52, %v2608_v30 }
 0xadd   :  { %v2632_v60 = vmax.f32 %v520_v56, %v679_v59  ;;  %v2634_v42 = vadd.f32 %v679_v59, %v521_v57  ;;  %764 = vrot.lane.b32.xlu1 %v2629_v44, %s2260_s1  ;;  %v758_v49 = vsel %vm682_vm10, %v755_v58, 0.0  ;;  %v2643_v61 = vsel %vm682_vm10, %v755_v58, %v2561_v53 }
 0xade   :  { %760 = vrot.lane.b32.xlu0 %v758_v49, %s2261_s19  ;;  %v843_v51 = vpack.c.bf16 %v2643_v61, %v2643_v61  ;;  %v157_v53 = vadd.f32 %v2348_v8, %v2421_v46 }
 0xae2   :  { %845 = vrot.lane.b32.xlu0 %v843_v51, %s2261_s19 }
 0xb4f   :  { %v765_v62 = vpop.permute.xlu1 %764 }
 0xb50   :  { %v761_v63 = vpop.permute.xlu0 %760 }
 0xb51   :  { %v767_v1 = vsel %vm184_vm6, %v761_v63, %v765_v62 }
 0xb52   :  { %v768_v3 = vpack.c.bf16 %v767_v1, %v767_v1 }
 0xb54   :  { %v846_v4 = vpop.permute.xlu0 %845  ;;  %1980 = vmatmul.mubr.msk.bf16.vlgmr.msra.gmra.mrb[16].mxu1 %vm290_vm7, %v768_v3 }
 0xb55   :  { %1988 = vmatmul.mubr.msk.bf16.vlgmr.msra.gmra.mrb[20].mxu0 %vm184_vm6, %v846_v4  ;;  %2004 = vmatpush3.bf16.msra.mxu1 %v2316_v2 }
 0xb56   :  { %1992 = vmatpush3.bf16.msra.mxu0 %v2371_v33  ;;  %2005 = vmatprep.subr.bf16.mxu1 %v2257_v0 }
 0xb57   :  { %1993 = vmatprep.subr.bf16.mxu0 %v2257_v0  ;;  %1999 = vmatprep.mubr.msk.bf16.mxu0 %vm2258_vm0, %v2257_v0 }
 0xb58   :  { %2007 = vmatprep.mubr.msk.bf16.mxu1 %vm2258_vm0, %v2257_v0 }
 0xb59   :  { %2006 = vmatpush3.bf16.msra.mxu1 %v2330_v6 }
 0xb5a   :  { %1994 = vmatpush3.bf16.msra.mxu0 %v2383_v36  ;;  %2011 = vmatprep.subr.bf16.mxu1 %v2257_v0 }
 0xb5b   :  { %1995 = vmatprep.subr.bf16.mxu0 %v2257_v0 }
 0xb5e   :  { %1996 = vmatpush3.bf16.msra.mxu0 %v2394_v37 }
 0xb5f   :  { %1997 = vmatprep.subr.bf16.mxu0 %v2257_v0 }
 0xb62   :  { %1998 = vmatpush3.bf16.msra.mxu0 %v2403_v39 }
 0xb63   :  { %2023 = vmatprep.subr.bf16.mxu0 %v2257_v0 }
 0xc27   :  { %v806_v5 = vpop.f32.mrb[16].mxu1 }
 0xc28   :  { %v807_v7 = vadd.f32 %v2451_v54, %v806_v5  ;;  %v1981_v10 = vpop.f32.mrb[17].mxu1  ;;  %v884_v11 = vpop.f32.mrb[20].mxu0 }
 0xc29   :  { %v890_v13 = vadd.f32 %v884_v11, %v157_v53  ;;  %v809_v9 = vpop.f32.mrb[18].mxu1  ;;  %v1989_v14 = vpop.f32.mrb[21].mxu0 }
 0xc2a   :  { %v1781_v15 = vmul.f32 -1.442695, %v807_v7  ;;  %v1982_v12 = vpop.f32.mrb[19].mxu1  ;;  %v887_v16 = vpop.f32.mrb[22].mxu0 }
 0xc2b   :  { %v1783_v17 = vmul.f32 -1.442695, %v890_v13  ;;  %v1990_v18 = vpop.f32.mrb[23].mxu0 }
 0xc2c   :  { %2177 = vpow2.f32 %v1781_v15 }
 0xc2d   :  { %2179 = vpow2.f32 %v1783_v17 }
 0xc2e   :  { %2181 = vtanh.f32 %v807_v7 }
 0xc2f   :  { %2183 = vtanh.f32 %v890_v13 }
 0xc36   :  { %v2178_v19 = vpop.eup %2177 }
 0xc37   :  { %v2180_v20 = vpop.eup %2179  ;;  %v816_v21 = vadd.f32 1.0, %v2178_v19 }
 0xc38   :  { %v895_v46 = vadd.f32 1.0, %v2180_v20  ;;  %v2182_v22 = vpop.eup %2181 }
 0xc39   :  { %2185 = vrcp.f32 %v816_v21  ;;  %v2184_v25 = vpop.eup %2183 }
 0xc3a   :  { %2187 = vrcp.f32 %v895_v46 }
 0xc43   :  { %v2186_v29 = vpop.eup %2185 }
 0xc44   :  { %v2188_v31 = vpop.eup %2187  ;;  %v819_v32 = vsel %vm2357_vm4, %v2182_v22, %v2186_v29 }
 0xc45   :  { %822 = vrot.lane.b32.xlu1 %v819_v32, %s2260_s1  ;;  %v898_v41 = vsel %vm2357_vm4, %v2184_v25, %v2188_v31  ;;  %v820_v38 = vmul.f32 %v819_v32, %v2683_v27 }
 0xc46   :  { %901 = vrot.lane.b32.xlu0 %v898_v41, %s2260_s1  ;;  %v899_v56 = vmul.f32 %v898_v41, %v2690_v43 }
 0xcb7   :  { %v823_v23 = vpop.permute.xlu1 %822 }
 0xcb8   :  { %v825_v50 = vmul.f32 %v823_v23, %v819_v32  ;;  %v902_v26 = vpop.permute.xlu0 %901 }
 0xcb9   :  { %v904_v35 = vmul.f32 %v902_v26, %v898_v41 }
 0xcba   :  { %827 = vrot.lane.b32.xlu1 %v825_v50, %s2261_s19 }
 0xcbb   :  { %906 = vrot.lane.b32.xlu0 %v904_v35, %s2261_s19 }
 0xd2c   :  { %v828_v55 = vpop.permute.xlu1 %827 }
 0xd2d   :  { %v2693_v57 = vadd.f32 %v828_v55, %v820_v38  ;;  %v907_v58 = vpop.permute.xlu0 %906 }
 0xd2e   :  { %v2695_v59 = vadd.f32 %v907_v58, %v899_v56 }
 0xd2f   :  { %2189 = vtanh.f32 %v2693_v57  ;;  %v2764_v38 = vsel %vm682_vm10, %v2693_v57, %v2683_v27 }
 0xd30   :  { %2191 = vtanh.f32 %v2695_v59  ;;  %v2771_v56 = vsel %vm842_vm11, %v2695_v59, %v2690_v43 }
 0xd39   :  { %v2190_v34 = vpop.eup %2189 }
 0xd3a   :  { %v2192_v28 = vpop.eup %2191  ;;  %833 = vrot.lane.b32.xlu1 %v2190_v34, %s2260_s1 }
 0xd3b   :  { %912 = vrot.lane.b32.xlu0 %v2192_v28, %s2260_s1 }
 0xdac   :  { %v834_v30 = vpop.permute.xlu1 %833 }
 0xdad   :  { %v836_v52 = vmul.f32 %v834_v30, %v819_v32  ;;  %v913_v49 = vpop.permute.xlu0 %912 }
 0xdae   :  { %v915_v51 = vmul.f32 %v913_v49, %v898_v41 }
 0xdaf   :  { %v2703_v62 = vsel %vm682_vm10, %v836_v52, 0.0  ;;  %v2708_v63 = vsel %vm682_vm10, %v836_v52, %v2629_v44 }
 0xdb0   :  { %v840_v1 = vmax.f32 %v2632_v60, %v2703_v62  ;;  %v2715_v3 = vadd.f32 %v2703_v62, %v2634_v42  ;;  %924 = vrot.lane.b32.xlu0 %v2708_v63, %s2260_s1  ;;  %v918_v4 = vsel %vm842_vm11, %v915_v51, 0.0  ;;  %v2724_v44 = vsel %vm842_vm11, %v915_v51, %v2643_v61 }
 0xdb1   :  { %920 = vrot.lane.b32.xlu1 %v918_v4, %s2261_s19  ;;  %v1003_v53 = vpack.c.bf16 %v2724_v44, %v2724_v44 }
 0xdb5   :  { %1005 = vrot.lane.b32.xlu1 %v1003_v53, %s2261_s19 }
 0xe22   :  { %v925_v42 = vpop.permute.xlu0 %924 }
 0xe23   :  { %v921_v5 = vpop.permute.xlu1 %920 }
 0xe24   :  { %v927_v7 = vsel %vm184_vm6, %v921_v5, %v925_v42 }
 0xe25   :  { %v928_v10 = vpack.c.bf16 %v927_v7, %v927_v7 }
 0xe27   :  { %2000 = vmatmul.mubr.msk.bf16.vlgmr.msra.gmra.mrb[24].mxu0 %vm290_vm7, %v928_v10  ;;  %v1006_v11 = vpop.permute.xlu1 %1005 }
 0xe28   :  { %2008 = vmatmul.mubr.msk.bf16.vlgmr.msra.gmra.mrb[20].mxu1 %vm184_vm6, %v1006_v11  ;;  %2024 = vmatpush3.bf16.msra.mxu0 %v2316_v2  ;;  %v160_v2 = vadd.f32 %v2348_v8, %v2425_v48 }
 0xe29   :  { %2012 = vmatpush3.bf16.msra.mxu1 %v2371_v33  ;;  %2025 = vmatprep.subr.bf16.mxu0 %v2257_v0 }
 0xe2a   :  { %2013 = vmatprep.subr.bf16.mxu1 %v2257_v0  ;;  %2019 = vmatprep.mubr.msk.bf16.mxu1 %vm2258_vm0, %v2257_v0 }
 0xe2b   :  { %2027 = vmatprep.mubr.msk.bf16.mxu0 %vm2258_vm0, %v2257_v0 }
 0xe2c   :  { %2026 = vmatpush3.bf16.msra.mxu0 %v2330_v6 }
 0xe2d   :  { %2014 = vmatpush3.bf16.msra.mxu1 %v2383_v36  ;;  %2031 = vmatprep.subr.bf16.mxu0 %v2257_v0 }
 0xe2e   :  { %2015 = vmatprep.subr.bf16.mxu1 %v2257_v0 }
 0xe31   :  { %2016 = vmatpush3.bf16.msra.mxu1 %v2394_v37 }
 0xe32   :  { %2017 = vmatprep.subr.bf16.mxu1 %v2257_v0 }
 0xe35   :  { %2018 = vmatpush3.bf16.msra.mxu1 %v2403_v39 }
 0xe36   :  { %2043 = vmatprep.subr.bf16.mxu1 %v2257_v0 }
 0xefa   :  { %v966_v61 = vpop.f32.mrb[24].mxu0 }
 0xefb   :  { %v967_v6 = vadd.f32 %v2451_v54, %v966_v61  ;;  %v2001_v13 = vpop.f32.mrb[25].mxu0  ;;  %v1044_v9 = vpop.f32.mrb[20].mxu1 }
 0xefc   :  { %v1050_v14 = vadd.f32 %v1044_v9, %v160_v2  ;;  %v969_v15 = vpop.f32.mrb[26].mxu0  ;;  %v2009_v12 = vpop.f32.mrb[21].mxu1  ;;  %v2250_v2 = vld [vmem:[%s3024_s2 + $0x10] sm:$0xff]  }
 0xefd   :  { %v1785_v16 = vmul.f32 -1.442695, %v967_v6  ;;  %v2002_v17 = vpop.f32.mrb[27].mxu0  ;;  %v1047_v18 = vpop.f32.mrb[22].mxu1 }
 0xefe   :  { %v1787_v19 = vmul.f32 -1.442695, %v1050_v14  ;;  %v2010_v20 = vpop.f32.mrb[23].mxu1 }
 0xeff   :  { %2193 = vpow2.f32 %v1785_v16 }
 0xf00   :  { %2195 = vpow2.f32 %v1787_v19 }
 0xf01   :  { %2197 = vtanh.f32 %v967_v6 }
 0xf02   :  { %2199 = vtanh.f32 %v1050_v14 }
 0xf09   :  { %v2194_v21 = vpop.eup %2193 }
 0xf0a   :  { %v2196_v46 = vpop.eup %2195  ;;  %v976_v22 = vadd.f32 1.0, %v2194_v21 }
 0xf0b   :  { %v1055_v8 = vadd.f32 1.0, %v2196_v46  ;;  %v2198_v48 = vpop.eup %2197 }
 0xf0c   :  { %2201 = vrcp.f32 %v976_v22  ;;  %v2200_v25 = vpop.eup %2199 }
 0xf0d   :  { %2203 = vrcp.f32 %v1055_v8 }
 0xf16   :  { %v2202_v29 = vpop.eup %2201 }
 0xf17   :  { %v2204_v31 = vpop.eup %2203  ;;  %v979_v32 = vsel %vm2357_vm4, %v2198_v48, %v2202_v29 }
 0xf18   :  { %982 = vrot.lane.b32.xlu0 %v979_v32, %s2260_s1  ;;  %v1058_v41 = vsel %vm2357_vm4, %v2200_v25, %v2204_v31  ;;  %v980_v55 = vmul.f32 %v979_v32, %v2764_v38 }
 0xf19   :  { %1061 = vrot.lane.b32.xlu1 %v1058_v41, %s2260_s1  ;;  %v1059_v34 = vmul.f32 %v1058_v41, %v2771_v56 }
 0xf8a   :  { %v983_v23 = vpop.permute.xlu0 %982 }
 0xf8b   :  { %v985_v50 = vmul.f32 %v983_v23, %v979_v32  ;;  %v1062_v26 = vpop.permute.xlu1 %1061 }
 0xf8c   :  { %v1064_v35 = vmul.f32 %v1062_v26, %v1058_v41 }
 0xf8d   :  { %987 = vrot.lane.b32.xlu0 %v985_v50, %s2261_s19 }
 0xf8e   :  { %1066 = vrot.lane.b32.xlu1 %v1064_v35, %s2261_s19 }
 0xfff   :  { %v988_v58 = vpop.permute.xlu0 %987 }
0x1000   :  { %v2774_v28 = vadd.f32 %v988_v58, %v980_v55  ;;  %v1067_v30 = vpop.permute.xlu1 %1066 }
0x1001   :  { %v2776_v52 = vadd.f32 %v1067_v30, %v1059_v34 }
0x1002   :  { %2205 = vtanh.f32 %v2774_v28  ;;  %v2854_v23 = vsel %vm842_vm11, %v2774_v28, %v2764_v38 }
0x1003   :  { %2207 = vtanh.f32 %v2776_v52  ;;  %v2861_v26 = vsel %vm1002_vm12, %v2776_v52, %v2771_v56 }
0x100c   :  { %v2206_v27 = vpop.eup %2205 }
0x100d   :  { %v2208_v57 = vpop.eup %2207  ;;  %993 = vrot.lane.b32.xlu0 %v2206_v27, %s2260_s1 }
0x100e   :  { %1072 = vrot.lane.b32.xlu1 %v2208_v57, %s2260_s1 }
0x107f   :  { %v994_v43 = vpop.permute.xlu0 %993 }
0x1080   :  { %v996_v59 = vmul.f32 %v994_v43, %v979_v32  ;;  %v1073_v49 = vpop.permute.xlu1 %1072 }
0x1081   :  { %v1075_v51 = vmul.f32 %v1073_v49, %v1058_v41 }
0x1082   :  { %v999_v4 = vsel %vm842_vm11, %v996_v59, 0.0  ;;  %v2787_v53 = vsel %vm842_vm11, %v996_v59, %v2708_v63 }
0x1083   :  { %v2793_v42 = vmax.f32 %v840_v1, %v999_v4  ;;  %v2796_v5 = vadd.f32 %v999_v4, %v2715_v3  ;;  %1084 = vrot.lane.b32.xlu1 %v2787_v53, %s2260_s1  ;;  %v1078_v7 = vsel %vm1002_vm12, %v1075_v51, 0.0  ;;  %v2805_v63 = vsel %vm1002_vm12, %v1075_v51, %v2724_v44  ;;  %v2249_v44 = vld [vmem:[%s3024_s2 + $0x8] sm:$0xff]  }
0x1084   :  { %1080 = vrot.lane.b32.xlu0 %v1078_v7, %s2261_s19  ;;  %v1163_v60 = vpack.c.bf16 %v2805_v63, %v2805_v63 }
0x1088   :  { %1165 = vrot.lane.b32.xlu0 %v1163_v60, %s2261_s19 }
0x10f5   :  { %v1085_v62 = vpop.permute.xlu1 %1084 }
0x10f6   :  { %v1081_v1 = vpop.permute.xlu0 %1080 }
0x10f7   :  { %v1087_v3 = vsel %vm184_vm6, %v1081_v1, %v1085_v62 }
0x10f8   :  { %v1088_v10 = vpack.c.bf16 %v1087_v3, %v1087_v3 }
0x10fa   :  { %v1166_v11 = vpop.permute.xlu0 %1165  ;;  %2020 = vmatmul.mubr.msk.bf16.vlgmr.msra.gmra.mrb[24].mxu1 %vm290_vm7, %v1088_v10  ;;  %v2253_v10 = vld [vmem:[%s3024_s2 + $0x20] sm:$0xff]  }
0x10fb   :  { %2028 = vmatmul.mubr.msk.bf16.vlgmr.msra.gmra.mrb[28].mxu0 %vm184_vm6, %v1166_v11  ;;  %2044 = vmatpush3.bf16.msra.mxu1 %v2249_v44  ;;  %v2254_v11 = vld [vmem:[%s3024_s2 + $0x28] sm:$0xff]   ;;  %v2255_v44 = vld [vmem:[%s3024_s2 + $0x30] sm:$0xff]  }
0x10fc   :  { %2032 = vmatpush3.bf16.msra.mxu0 %v2371_v33  ;;  %2045 = vmatprep.subr.bf16.mxu1 %v2257_v0  ;;  %v2837_v33 = vld [vmem:[%s3027_s3] ss:$0 sm:$0xff] }
0x10fd   :  { %2033 = vmatprep.subr.bf16.mxu0 %v2257_v0  ;;  %2039 = vmatprep.mubr.msk.bf16.mxu0 %vm2258_vm0, %v2257_v0 }
0x10fe   :  { %2047 = vmatprep.mubr.msk.bf16.mxu1 %vm2258_vm0, %v2257_v0 }
0x10ff   :  { %2046 = vmatpush3.bf16.msra.mxu1 %v2250_v2  ;;  %v168_v2 = vadd.f32 %v2837_v33, %v2423_v47 }
0x1100   :  { %2034 = vmatpush3.bf16.msra.mxu0 %v2383_v36  ;;  %2051 = vmatprep.subr.bf16.mxu1 %v2257_v0  ;;  %v165_v36 = vadd.f32 %v2837_v33, %v2419_v45 }
0x1101   :  { %2035 = vmatprep.subr.bf16.mxu0 %v2257_v0 }
0x1104   :  { %2036 = vmatpush3.bf16.msra.mxu0 %v2394_v37 }
0x1105   :  { %2037 = vmatprep.subr.bf16.mxu0 %v2257_v0 }
0x1108   :  { %2038 = vmatpush3.bf16.msra.mxu0 %v2403_v39 }
0x1109   :  { %2063 = vmatprep.subr.bf16.mxu0 %v2257_v0 }
0x11cd   :  { %v1126_v61 = vpop.f32.mrb[24].mxu1 }
0x11ce   :  { %v1127_v6 = vadd.f32 %v2451_v54, %v1126_v61  ;;  %v2021_v13 = vpop.f32.mrb[25].mxu1  ;;  %v1204_v9 = vpop.f32.mrb[28].mxu0  ;;  %v2925_v61 = vld [vmem:[%s3027_s3 + $0x1] ss:$0 sm:$0xff] }
0x11cf   :  { %v1210_v37 = vadd.f32 %v1204_v9, %v165_v36  ;;  %v1129_v14 = vpop.f32.mrb[26].mxu1  ;;  %v2029_v15 = vpop.f32.mrb[29].mxu0 }
0x11d0   :  { %v1789_v12 = vmul.f32 -1.442695, %v1127_v6  ;;  %v2022_v39 = vpop.f32.mrb[27].mxu1  ;;  %v1207_v16 = vpop.f32.mrb[30].mxu0 }
0x11d1   :  { %v1791_v17 = vmul.f32 -1.442695, %v1210_v37  ;;  %v2030_v18 = vpop.f32.mrb[31].mxu0 }
0x11d2   :  { %2209 = vpow2.f32 %v1789_v12 }
0x11d3   :  { %2211 = vpow2.f32 %v1791_v17 }
0x11d4   :  { %2213 = vtanh.f32 %v1127_v6 }
0x11d5   :  { %2215 = vtanh.f32 %v1210_v37 }
0x11dc   :  { %v2210_v19 = vpop.eup %2209 }
0x11dd   :  { %v2212_v20 = vpop.eup %2211  ;;  %v1136_v21 = vadd.f32 1.0, %v2210_v19 }
0x11de   :  { %v1215_v45 = vadd.f32 1.0, %v2212_v20  ;;  %v2214_v54 = vpop.eup %2213 }
0x11df   :  { %2217 = vrcp.f32 %v1136_v21  ;;  %v2216_v46 = vpop.eup %2215 }
0x11e0   :  { %2219 = vrcp.f32 %v1215_v45 }
0x11e9   :  { %v2218_v22 = vpop.eup %2217 }
0x11ea   :  { %v2220_v8 = vpop.eup %2219  ;;  %v1139_v48 = vsel %vm2357_vm4, %v2214_v54, %v2218_v22 }
0x11eb   :  { %1142 = vrot.lane.b32.xlu1 %v1139_v48, %s2260_s1  ;;  %v1218_v25 = vsel %vm2357_vm4, %v2216_v46, %v2220_v8  ;;  %v1140_v50 = vmul.f32 %v1139_v48, %v2854_v23 }
0x11ec   :  { %1221 = vrot.lane.b32.xlu0 %v1218_v25, %s2260_s1  ;;  %v1219_v55 = vmul.f32 %v1218_v25, %v2861_v26 }
0x125d   :  { %v1143_v29 = vpop.permute.xlu1 %1142 }
0x125e   :  { %v1145_v31 = vmul.f32 %v1143_v29, %v1139_v48  ;;  %v1222_v32 = vpop.permute.xlu0 %1221 }
0x125f   :  { %v1224_v41 = vmul.f32 %v1222_v32, %v1218_v25 }
0x1260   :  { %1147 = vrot.lane.b32.xlu1 %v1145_v31, %s2261_s19 }
0x1261   :  { %1226 = vrot.lane.b32.xlu0 %v1224_v41, %s2261_s19 }
0x12d2   :  { %v1148_v35 = vpop.permute.xlu1 %1147 }
0x12d3   :  { %v2864_v58 = vadd.f32 %v1148_v35, %v1140_v50  ;;  %v1227_v34 = vpop.permute.xlu0 %1226 }
0x12d4   :  { %v2866_v30 = vadd.f32 %v1227_v34, %v1219_v55 }
0x12d5   :  { %2221 = vtanh.f32 %v2864_v58  ;;  %v1158_v32 = vsel %vm1002_vm12, %v2864_v58, %v2854_v23 }
0x12d6   :  { %2223 = vtanh.f32 %v2866_v30  ;;  %v1237_v50 = vsel %vm1162_vm13, %v2866_v30, %v2861_v26 }
0x12df   :  { %v2222_v38 = vpop.eup %2221 }
0x12e0   :  { %v2224_v28 = vpop.eup %2223  ;;  %1153 = vrot.lane.b32.xlu1 %v2222_v38, %s2260_s1 }
0x12e1   :  { %1232 = vrot.lane.b32.xlu0 %v2224_v28, %s2260_s1 }
0x1352   :  { %v1154_v56 = vpop.permute.xlu1 %1153 }
0x1353   :  { %v1156_v52 = vmul.f32 %v1154_v56, %v1139_v48  ;;  %v1233_v27 = vpop.permute.xlu0 %1232 }
0x1354   :  { %v1235_v57 = vmul.f32 %v1233_v27, %v1218_v25 }
0x1355   :  { %v2874_v43 = vsel %vm1002_vm12, %v1156_v52, 0.0  ;;  %v2879_v59 = vsel %vm1002_vm12, %v1156_v52, %v2787_v53 }
0x1356   :  { %v1160_v49 = vmax.f32 %v2793_v42, %v2874_v43  ;;  %v2886_v51 = vadd.f32 %v2874_v43, %v2796_v5  ;;  %1244 = vrot.lane.b32.xlu0 %v2879_v59, %s2260_s1  ;;  %v1238_v4 = vsel %vm1162_vm13, %v1235_v57, 0.0  ;;  %v1236_v53 = vsel %vm1162_vm13, %v1235_v57, %v2805_v63  ;;  %v2252_v63 = vld [vmem:[%s3024_s2 + $0x18] sm:$0xff]  }
0x1357   :  { %1240 = vrot.lane.b32.xlu1 %v1238_v4, %s2261_s19  ;;  %v1323_v7 = vpack.c.bf16 %v1236_v53, %v1236_v53 }
0x135b   :  { %1325 = vrot.lane.b32.xlu1 %v1323_v7, %s2261_s19 }
0x13c8   :  { %v1245_v60 = vpop.permute.xlu0 %1244 }
0x13c9   :  { %v1241_v62 = vpop.permute.xlu1 %1240 }
0x13ca   :  { %v1247_v5 = vsel %vm184_vm6, %v1241_v62, %v1245_v60 }
0x13cb   :  { %v1248_v1 = vpack.c.bf16 %v1247_v5, %v1247_v5 }
0x13cd   :  { %2040 = vmatmul.mubr.msk.bf16.vlgmr.msra.gmra.mrb[32].mxu0 %vm290_vm7, %v1248_v1  ;;  %v1326_v3 = vpop.permute.xlu1 %1325 }
0x13ce   :  { %2048 = vmatmul.mubr.msk.bf16.vlgmr.msra.gmra.mrb[28].mxu1 %vm184_vm6, %v1326_v3  ;;  %2067 = vmatprep.mubr.msk.bf16.mxu0 %vm2258_vm0, %v2257_v0 }
0x13cf   :  { %2052 = vmatpush3.bf16.msra.mxu1 %v2252_v63  ;;  %2059 = vmatprep.mubr.msk.bf16.mxu1 %vm2258_vm0, %v2257_v0 }
0x13d0   :  { %2053 = vmatprep.subr.bf16.mxu1 %v2257_v0  ;;  %2064 = vmatpush3.bf16.msra.mxu0 %v2113_v24 }
0x13d1   :  { %2065 = vmatprep.subr.bf16.mxu0 %v2257_v0 }
0x13d3   :  { %2054 = vmatpush3.bf16.msra.mxu1 %v2253_v10 }
0x13d4   :  { %2055 = vmatprep.subr.bf16.mxu1 %v2257_v0 }
0x13d7   :  { %2056 = vmatpush3.bf16.msra.mxu1 %v2254_v11 }
0x13d8   :  { %2057 = vmatprep.subr.bf16.mxu1 %v2257_v0 }
0x13db   :  { %2058 = vmatpush3.bf16.msra.mxu1 %v2255_v44 }
0x13dc   :  { %2079 = vmatprep.subr.bf16.mxu1 %v2257_v0 }
0x14a0   :  { %v1286_v36 = vpop.f32.mrb[32].mxu0 }
0x14a1   :  { %v1287_v6 = vadd.f32 %v2925_v61, %v1286_v36  ;;  %v2041_v13 = vpop.f32.mrb[33].mxu0  ;;  %v1364_v9 = vpop.f32.mrb[28].mxu1 }
0x14a2   :  { %v1370_v37 = vadd.f32 %v1364_v9, %v168_v2  ;;  %v1289_v14 = vpop.f32.mrb[34].mxu0  ;;  %v2049_v15 = vpop.f32.mrb[29].mxu1 }
0x14a3   :  { %v1793_v12 = vmul.f32 -1.442695, %v1287_v6  ;;  %v2042_v39 = vpop.f32.mrb[35].mxu0  ;;  %v1367_v16 = vpop.f32.mrb[30].mxu1  ;;  %v2114_v15 = vld [vmem:[%s3028_s4 + $0x18] sm:$0xff]  }
0x14a4   :  { %v1795_v17 = vmul.f32 -1.442695, %v1370_v37  ;;  %v2050_v18 = vpop.f32.mrb[31].mxu1  ;;  %2066 = vmatpush3.bf16.msra.mxu0 %v2114_v15  ;;  %v2117_v39 = vld [vmem:[%s3028_s4 + $0x28] sm:$0xff]  }
0x14a5   :  { %2225 = vpow2.f32 %v1793_v12  ;;  %v2115_v12 = vld [vmem:[%s3028_s4 + $0x20] sm:$0xff]   ;;  %2071 = vmatprep.subr.bf16.mxu0 %v2257_v0 }
0x14a6   :  { %2227 = vpow2.f32 %v1795_v17 }
0x14a7   :  { %2229 = vtanh.f32 %v1287_v6 }
0x14a8   :  { %2231 = vtanh.f32 %v1370_v37 }
0x14af   :  { %v2226_v47 = vpop.eup %2225 }
0x14b0   :  { %v2228_v33 = vpop.eup %2227  ;;  %v1296_v19 = vadd.f32 1.0, %v2226_v47 }
0x14b1   :  { %v1375_v20 = vadd.f32 1.0, %v2228_v33  ;;  %v2230_v21 = vpop.eup %2229 }
0x14b2   :  { %2233 = vrcp.f32 %v1296_v19  ;;  %v2232_v45 = vpop.eup %2231 }
0x14b3   :  { %2235 = vrcp.f32 %v1375_v20 }
0x14bc   :  { %v2234_v54 = vpop.eup %2233 }
0x14bd   :  { %v2236_v46 = vpop.eup %2235  ;;  %v1299_v22 = vsel %vm2357_vm4, %v2230_v21, %v2234_v54  ;;  %v2116_v54 = vld [vmem:[%s3028_s4] sm:$0xff]  }
0x14be   :  { %1302 = vrot.lane.b32.xlu0 %v1299_v22, %s2260_s1  ;;  %v1378_v8 = vsel %vm2357_vm4, %v2232_v45, %v2236_v46  ;;  %v1300_v41 = vmul.f32 %v1299_v22, %v1158_v32 }
0x14bf   :  { %1381 = vrot.lane.b32.xlu1 %v1378_v8, %s2260_s1  ;;  %v1379_v55 = vmul.f32 %v1378_v8, %v1237_v50 }
0x1530   :  { %v1303_v48 = vpop.permute.xlu0 %1302 }
0x1531   :  { %v1305_v25 = vmul.f32 %v1303_v48, %v1299_v22  ;;  %v1382_v29 = vpop.permute.xlu1 %1381  ;;  %v2119_v48 = vld [vmem:[%s3029_s6] sm:$0xff]  }
0x1532   :  { %v1384_v31 = vmul.f32 %v1382_v29, %v1378_v8 }
0x1533   :  { %1307 = vrot.lane.b32.xlu0 %v1305_v25, %s2261_s19  ;;  %v2120_v25 = vld [vmem:[%s3029_s6 + $0x8] sm:$0xff]  }
0x1534   :  { %1386 = vrot.lane.b32.xlu1 %v1384_v31, %s2261_s19 }
0x15a5   :  { %v1308_v35 = vpop.permute.xlu0 %1307 }
0x15a6   :  { %v1310_v34 = vadd.f32 %v1308_v35, %v1300_v41  ;;  %v1387_v38 = vpop.permute.xlu1 %1386 }
0x15a7   :  { %v1389_v28 = vadd.f32 %v1387_v38, %v1379_v55 }
0x15a8   :  { %2237 = vtanh.f32 %v1310_v34 }
0x15a9   :  { %2239 = vtanh.f32 %v1389_v28 }
0x15b2   :  { %v2238_v56 = vpop.eup %2237 }
0x15b3   :  { %v2240_v52 = vpop.eup %2239  ;;  %1313 = vrot.lane.b32.xlu0 %v2238_v56, %s2260_s1 }
0x15b4   :  { %1392 = vrot.lane.b32.xlu1 %v2240_v52, %s2260_s1 }
0x1625   :  { %v1314_v23 = vpop.permute.xlu0 %1313 }
0x1626   :  { %v1316_v58 = vmul.f32 %v1314_v23, %v1299_v22  ;;  %v1393_v27 = vpop.permute.xlu1 %1392 }
0x1627   :  { %v1395_v57 = vmul.f32 %v1393_v27, %v1378_v8 }
0x1628   :  { %v1319_v26 = vsel %vm1162_vm13, %v1316_v58, 0.0  ;;  %v1317_v30 = vsel %vm1162_vm13, %v1316_v58, %v2879_v59 }
0x1629   :  { %v1320_v4 = vmax.f32 %v1160_v49, %v1319_v26  ;;  %v1321_v53 = vadd.f32 %v1319_v26, %v2886_v51  ;;  %1402 = vrot.lane.b32.xlu1 %v1317_v30, %s2260_s1  ;;  %v1396_v7 = vsel %vm1322_vm14, %v1395_v57, 0.0  ;;  %v1808_v30 = vld [vmem:[%s3031_s7] ss:$0 sm:$0xff] }
0x162a   :  { %1398 = vrot.lane.b32.xlu0 %v1396_v7, %s2261_s19 }
0x169b   :  { %v1403_v60 = vpop.permute.xlu1 %1402 }
0x169c   :  { %v1399_v62 = vpop.permute.xlu0 %1398 }
0x169d   :  { %v1405_v5 = vsel %vm184_vm6, %v1399_v62, %v1403_v60 }
0x169e   :  { %v1406_v59 = vpack.c.bf16 %v1405_v5, %v1405_v5 }
0x16a0   :  { %2060 = vmatmul.mubr.msk.bf16.vlgmr.msra.gmra.mrb[32].mxu1 %vm290_vm7, %v1406_v59 }
0x16a1   :  { %2083 = vmatprep.mubr.msk.bf16.mxu1 %vm2258_vm0, %v2257_v0  ;;  %2080 = vmatpush3.bf16.msra.mxu1 %v2115_v12 }
0x16a2   :  { %2081 = vmatprep.subr.bf16.mxu1 %v2257_v0 }
0x16a5   :  { %2082 = vmatpush3.bf16.msra.mxu1 %v2117_v39 }
0x1773   :  { %v1444_v42 = vpop.f32.mrb[32].mxu1 }
0x1774   :  { %v1445_v43 = vadd.f32 %v2925_v61, %v1444_v42  ;;  %v2061_v49 = vpop.f32.mrb[33].mxu1  ;;  %v1318_v61 = vsel %vm1162_vm13, %v1310_v34, %v1158_v32 }
0x1775   :  { %v1447_v51 = vpop.f32.mrb[34].mxu1 }
0x1776   :  { %v1797_v1 = vmul.f32 -1.442695, %v1445_v43  ;;  %v2062_v3 = vpop.f32.mrb[35].mxu1 }
0x1778   :  { %2241 = vpow2.f32 %v1797_v1 }
0x1779   :  { %2243 = vtanh.f32 %v1445_v43 }
0x1782   :  { %v2242_v63 = vpop.eup %2241 }
0x1783   :  { %v1454_v10 = vadd.f32 1.0, %v2242_v63  ;;  %v2244_v11 = vpop.eup %2243 }
0x1785   :  { %2245 = vrcp.f32 %v1454_v10 }
0x178f   :  { %v2246_v44 = vpop.eup %2245 }
0x1790   :  { %v1457_v2 = vsel %vm2357_vm4, %v2244_v11, %v2246_v44 }
0x1791   :  { %1460 = vrot.lane.b32.xlu0 %v1457_v2, %s2260_s1  ;;  %v1458_v13 = vmul.f32 %v1457_v2, %v1318_v61 }
0x1803   :  { %v1461_v36 = vpop.permute.xlu0 %1460 }
0x1804   :  { %v1463_v6 = vmul.f32 %v1461_v36, %v1457_v2 }
0x1806   :  { %1465 = vrot.lane.b32.xlu1 %v1463_v6, %s2261_s19 }
0x1878   :  { %v1466_v9 = vpop.permute.xlu1 %1465 }
0x1879   :  { %v1468_v37 = vadd.f32 %v1466_v9, %v1458_v13 }
0x187b   :  { %2247 = vtanh.f32 %v1468_v37 }
0x1885   :  { %v2248_v14 = vpop.eup %2247 }
0x1886   :  { %1471 = vrot.lane.b32.xlu0 %v2248_v14, %s2260_s1 }
0x18f8   :  { %v1472_v16 = vpop.permute.xlu0 %1471 }
0x18f9   :  { %v1474_v17 = vmul.f32 %v1472_v16, %v1457_v2 }
0x18fb   :  { %v1475_v18 = vsel %vm1322_vm14, %v1474_v17, 0.0 }
0x18fc   :  { %v1477_v47 = vadd.f32 %v1475_v18, %v1321_v53  ;;  %v1476_v33 = vmax.f32 %v1320_v4, %v1475_v18  ;;  %v1605_v45 = vpack.c.bf16 %v1475_v18, %v1475_v18 }
0x18fe   :  { %v1479_v19 = vpack.c.bf16 %v1476_v33, %v1476_v33  ;;  %v1478_v20 = vmul.f32 0.125, %v1477_v47 }
0x1900   :  { %1548 = vrot.lane.b32.xlu0 %v1479_v19, %s2261_s19  ;;  %v1484_v21 = vpack.c.bf16 %v1478_v20, %v1478_v20 }
0x1902   :  { %1490 = vrot.lane.b32.xlu1 %v1484_v21, %s2261_s19 }
0x1906   :  { %1611 = vrot.lane.b32.xlu1 %v1605_v45, %s2261_s19 }
0x1972   :  { %v1549_v8 = vpop.permute.xlu0 %1548 }
0x1974   :  { %v1491_v46 = vpop.permute.xlu1 %1490 }
0x1975   :  { %2068 = vmatmul.mubr.msk.bf16.vlgmr.msra.gmra.mrb[36].mxu0 %vm184_vm6, %v1491_v46 }
0x1976   :  { %2072 = vmatpush3.bf16.msra.mxu0 %v2116_v54  ;;  %2075 = vmatprep.mubr.msk.bf16.mxu0 %vm2258_vm0, %v2257_v0 }
0x1977   :  { %2073 = vmatprep.subr.bf16.mxu0 %v2257_v0 }
0x1978   :  { %v1612_v22 = vpop.permute.xlu1 %1611 }
0x1979   :  { %2084 = vmatmul.mubr.msk.bf16.vlgmr.msra.gmra.mrb[36].mxu1 %vm184_vm6, %v1612_v22 }
0x197a   :  { %2074 = vmatpush3.bf16.msra.mxu0 %v2118_v40 }
0x197b   :  { %2087 = vmatprep.subr.bf16.mxu0 %v2257_v0 }
0x197d   :  { %2076 = vmatmul.mubr.msk.bf16.vlgmr.msra.gmra.mrb[40].mxu0 %vm184_vm6, %v1549_v8 }
0x197e   :  { %2091 = vmatprep.mubr.msk.bf16.mxu0 %vm2258_vm0, %v2257_v0  ;;  %2088 = vmatpush3.bf16.msra.mxu0 %v2119_v48 }
0x197f   :  { %2089 = vmatprep.subr.bf16.mxu0 %v2257_v0  ;;  %v1807_v0 = vld [vmem:[%s3030_s5] ss:$0 sm:$0xff] }
0x1982   :  { %2090 = vmatpush3.bf16.msra.mxu0 %v2120_v25 }
0x1a48   :  { %v1541_v29 = vpop.f32.mrb[36].mxu0 }
0x1a49   :  { %v2069_v31 = vpop.f32.mrb[37].mxu0 }
0x1a4a   :  { %v1544_v32 = vpop.f32.mrb[38].mxu0 }
0x1a4b   :  { %v2070_v41 = vpop.f32.mrb[39].mxu0 }
0x1a4c   :  { %v1662_v50 = vpop.f32.mrb[36].mxu1 }
0x1a4d   :  { %v2085_v35 = vpop.f32.mrb[37].mxu1 }
0x1a4e   :  { %v1665_v55 = vpop.f32.mrb[38].mxu1 }
0x1a4f   :  { %v2086_v34 = vpop.f32.mrb[39].mxu1 }
0x1a50   :  { %v1599_v38 = vpop.f32.mrb[40].mxu0 }
0x1a51   :  { %v1600_v28 = vadd.f32 %v1599_v38, %v1541_v29  ;;  %v2077_v56 = vpop.f32.mrb[41].mxu0 }
0x1a52   :  { %v1602_v52 = vpop.f32.mrb[42].mxu0 }
0x1a53   :  { %v1668_v23 = vadd.f32 %v1662_v50, %v1600_v28  ;;  %v2078_v58 = vpop.f32.mrb[43].mxu0 }
0x1a55   :  { %v1676_v27 = vadd.f32 %v1807_v0, %v1668_v23 }
0x1a57   :  { %v1677_v57 = vmax.f32 %v1676_v27, 0.0 }
0x1a59   :  { %v1678_v26 = vpack.c.bf16 %v1677_v57, %v1677_v57 }
0x1a5b   :  { %2092 = vmatmul.mubr.msk.bf16.vlgmr.msra.gmra.mrb[44].mxu0 %vm184_vm6, %v1678_v26 }
0x1b2e   :  { %v1739_v4 = vpop.f32.mrb[44].mxu0 }
0x1b2f   :  { %v1740_v53 = vadd.f32 %v1808_v30, %v1739_v4  ;;  %v2093_v7 = vpop.f32.mrb[45].mxu0 }
0x1b30   :  { %v1742_v60 = vpop.f32.mrb[46].mxu0 }
0x1b31   :  { %1745 = vst [vmem:[%s3032_s8] sm:$0xff] %v1740_v53  ;;  %v2094_v62 = vpop.f32.mrb[47].mxu0 }

</bundles_post_ra>
